<compile_context>
chip_gen: v5e
topology: v5e:2x2
jax: 0.10.0
libtpu: 0.0.40
codegen_flags: <defaults>
</compile_context>

<pallas_src>
import math
import functools

import jax
import jax.numpy as jnp
from jax import lax
from jax.experimental import pallas as pl
from jax.experimental.pallas import tpu as pltpu


# ----------------------------------------------------------------------------- traced helpers

def _gelu_tanh(x):
    # tanh-approximate GELU (tanh runs on the EUP slot). |delta| vs exact erf-GELU ~3e-3.
    c = math.sqrt(2.0 / math.pi)
    return 0.5 * x * (1.0 + jnp.tanh(c * (x + 0.044715 * x * x * x)))


def _layernorm(v, g, b, eps):
    mu = jnp.mean(v, axis=-1, keepdims=True)
    var = jnp.mean((v - mu) ** 2, axis=-1, keepdims=True)
    return (v - mu) * lax.rsqrt(var + eps) * g + b


# ----------------------------------------------------------------------------- kernels

def patch_embed_kernel(p_ref, w_ref, b_ref, o_ref):
    # p_ref: (tm, C*p*p) bf16   w_ref: (C*p*p, D) bf16   b_ref: (1, D) f32   o_ref: (tm, D) f32
    o_ref[...] = (
        jnp.dot(p_ref[...], w_ref[...], preferred_element_type=jnp.float32) + b_ref[...]
    ).astype(o_ref.dtype)


def encoder_block_kernel(x_ref, bias_ref,
                         ln1_g_ref, ln1_b_ref,
                         w_in_ref, b_in_ref, wo_ref, bo_ref,
                         ln2_g_ref, ln2_b_ref,
                         w1_ref, b1_ref, w2_ref, b2_ref,
                         o_ref, ctx_ref, *, num_heads, eps):
    # One batch element per grid step.  Residual stream is f32 in VMEM/vregs; matmul operands
    # are bf16 with f32 accumulation (preferred_element_type).
    x = x_ref[0].astype(jnp.float32)                       # (S, D)
    S, D = x.shape
    hd = D // num_heads

    # --- LN1 + multi-head self-attention ---
    h = _layernorm(x, ln1_g_ref[...], ln1_b_ref[...], eps)
    qkv = jnp.dot(h.astype(jnp.bfloat16), w_in_ref[...],
                  preferred_element_type=jnp.float32) + b_in_ref[...]      # (S, 3D) f32

    scale = 1.0 / math.sqrt(hd)
    q = (qkv[:, 0:D] * scale).astype(jnp.bfloat16)
    k = qkv[:, D:2 * D].astype(jnp.bfloat16)
    v = qkv[:, 2 * D:3 * D].astype(jnp.bfloat16)
    bias = bias_ref[...]                                   # (1, S): 0 real keys, -1e30 pad keys

    # Per-head scores / PV: 2-D dots, context written directly into the (S, D) VMEM scratch.
    for hh in range(num_heads):                            # static unroll over heads
        sl = slice(hh * hd, (hh + 1) * hd)
        s = lax.dot_general(q[:, sl], k[:, sl], (((1,), (1,)), ((), ())),
                            preferred_element_type=jnp.float32) + bias     # (S, S)
        s = s - jnp.max(s, axis=-1, keepdims=True)
        e = jnp.exp(s)
        p = e * pl.reciprocal(jnp.sum(e, axis=-1, keepdims=True), approx=True)
        ctx_ref[:, sl] = jnp.dot(p.astype(jnp.bfloat16), v[:, sl],
                                 preferred_element_type=jnp.float32)

    attn = jnp.dot(ctx_ref[...].astype(jnp.bfloat16), wo_ref[...],
                   preferred_element_type=jnp.float32) + bo_ref[...]       # (S, D)
    x1 = x + attn                                          # residual (f32)

    # --- LN2 + MLP (Linear -> GELU -> Linear) ---
    h2 = _layernorm(x1, ln2_g_ref[...], ln2_b_ref[...], eps)
    m = jnp.dot(h2.astype(jnp.bfloat16), w1_ref[...],
                preferred_element_type=jnp.float32) + b1_ref[...]
    m = _gelu_tanh(m)
    m = jnp.dot(m.astype(jnp.bfloat16), w2_ref[...],
                preferred_element_type=jnp.float32) + b2_ref[...]

    o_ref[0] = (x1 + m).astype(o_ref.dtype)                # bf16 inter-layer activation


def final_ln_kernel(x_ref, g_ref, b_ref, o_ref, *, eps):
    # x_ref: (tn, D) bf16 class-token rows only (sliced in the wrapper -> no (N, S, D) DMA).
    x = x_ref[...].astype(jnp.float32)
    o_ref[...] = _layernorm(x, g_ref[...], b_ref[...], eps).astype(o_ref.dtype)


# ----------------------------------------------------------------------------- pallas wrappers

def patch_embed(patches, wt, b):
    M, K = patches.shape
    D = wt.shape[1]
    tm = min(256, M)                                       # row tile (full M for tiny inputs)
    return pl.pallas_call(
        patch_embed_kernel,
        out_shape=jax.ShapeDtypeStruct((M, D), jnp.float32),
        grid=(pl.cdiv(M, tm),),
        in_specs=[pl.BlockSpec((tm, K), lambda i: (i, 0)),
                  pl.BlockSpec((K, D), lambda i: (0, 0)),
                  pl.BlockSpec((1, D), lambda i: (0, 0))],
        out_specs=pl.BlockSpec((tm, D), lambda i: (i, 0)),
        compiler_params=pltpu.CompilerParams(dimension_semantics=("parallel",)),
    )(patches, wt, b)


def encoder_block(seq, attn_bias, layer, *, num_heads, eps):
    N, S, D = seq.shape
    ws = [layer['ln1_g'], layer['ln1_b'],
          layer['w_in'], layer['b_in'], layer['wo'], layer['bo'],
          layer['ln2_g'], layer['ln2_b'],
          layer['w1'], layer['b1'], layer['w2'], layer['b2']]
    # Weight block index never changes across the grid -> DMA'd once, kept resident in VMEM.
    w_specs = [pl.BlockSpec(w.shape, lambda n: (0, 0)) for w in ws]
    kern = functools.partial(encoder_block_kernel, num_heads=num_heads, eps=eps)
    return pl.pallas_call(
        kern,
        out_shape=jax.ShapeDtypeStruct((N, S, D), jnp.bfloat16),
        grid=(N,),
        in_specs=[pl.BlockSpec((1, S, D), lambda n: (n, 0, 0)),
                  pl.BlockSpec((1, S), lambda n: (0, 0))] + w_specs,
        out_specs=pl.BlockSpec((1, S, D), lambda n: (n, 0, 0)),
        scratch_shapes=[pltpu.VMEM((S, D), jnp.float32)],   # per-head context accumulator
        compiler_params=pltpu.CompilerParams(
            dimension_semantics=("parallel",),               # megacore shards over batch
            vmem_limit_bytes=48 * 1024 * 1024),              # bf16 ViT-B weights x2 < v7x 64 MiB
    )(seq, attn_bias, *ws)


def final_ln(cls_tok, g, b, *, eps):
    N, D = cls_tok.shape
    tn = min(N, 512)
    kern = functools.partial(final_ln_kernel, eps=eps)
    return pl.pallas_call(
        kern,
        out_shape=jax.ShapeDtypeStruct((N, D), jnp.float32),
        grid=(pl.cdiv(N, tn),),
        in_specs=[pl.BlockSpec((tn, D), lambda i: (i, 0)),
                  pl.BlockSpec((1, D), lambda i: (0, 0)),
                  pl.BlockSpec((1, D), lambda i: (0, 0))],
        out_specs=pl.BlockSpec((tn, D), lambda i: (i, 0)),
        compiler_params=pltpu.CompilerParams(dimension_semantics=("parallel",)),
    )(cls_tok, g, b)


# ----------------------------------------------------------------------------- model

def vit_forward(x, params, *, patch_size, num_heads, eps=1e-6):
    """x: (N, 3, H, W) float32 (NCHW).  Returns (N, hidden_dim) float32."""
    N, C, H, W = x.shape
    p = patch_size
    n_h, n_w = H // p, W // p
    P = n_h * n_w
    D = params['conv_w'].shape[0]
    assert D % num_heads == 0

    # conv_proj(kernel=stride=p) == per-patch linear projection (glue reshapes in plain JAX).
    patches = (x.reshape(N, C, n_h, p, n_w, p)
                 .transpose(0, 2, 4, 1, 3, 5)
                 .reshape(N * P, C * p * p)).astype(jnp.bfloat16)
    wt = params['conv_w'].reshape(D, C * p * p).T.astype(jnp.bfloat16)    # (C*p*p, D)
    bc = params['conv_b'].reshape(1, D)
    emb = patch_embed(patches, wt, bc).reshape(N, P, D)                   # f32

    cls = jnp.broadcast_to(params['class_token'], (N, 1, D))
    seq = jnp.concatenate([cls, emb], axis=1)                             # (N, S, D), S = P + 1
    seq = seq + params['pos_embedding']                                   # broadcast over batch

    # Pad S to a sublane multiple; padded keys are masked in-kernel so results are unchanged.
    S = P + 1
    S_pad = ((S + 7) // 8) * 8
    seq = jnp.pad(seq, ((0, 0), (0, S_pad - S), (0, 0))).astype(jnp.bfloat16)
    attn_bias = jnp.where(jnp.arange(S_pad) < S, 0.0, -1e30).astype(jnp.float32)[None, :]

    for layer in params['layers']:
        lw = {
            'ln1_g': layer['ln1_g'], 'ln1_b': layer['ln1_b'],
            'w_in': layer['w_in'].astype(jnp.bfloat16), 'b_in': layer['b_in'],
            'wo':   layer['wo'].astype(jnp.bfloat16),   'bo':   layer['bo'],
            'ln2_g': layer['ln2_g'], 'ln2_b': layer['ln2_b'],
            'w1':   layer['w1'].astype(jnp.bfloat16),   'b1':   layer['b1'],
            'w2':   layer['w2'].astype(jnp.bfloat16),   'b2':   layer['b2'],
        }
        seq = encoder_block(seq, attn_bias, lw, num_heads=num_heads, eps=eps)

    # Only the class token (N, D) goes through the final LayerNorm kernel.
    cls_tok = seq[:, 0, :]
    return final_ln(cls_tok, params['ln_g'], params['ln_b'], eps=eps)


def init_params(key, *, image_size, patch_size, num_layers, hidden_dim, mlp_dim):
    C = 3
    P = (image_size // patch_size) ** 2
    S = P + 1
    D, M = hidden_dim, mlp_dim

    def nrm(k, shape, std):
        return (std * jax.random.normal(k, shape)).astype(jnp.float32)

    keys = jax.random.split(key, 2 + 6 * num_layers)
    ki = iter(keys)

    params = {
        'conv_w': nrm(next(ki), (D, C, patch_size, patch_size),
                      math.sqrt(1.0 / (C * patch_size * patch_size))),
        'conv_b': jnp.zeros((D,), jnp.float32),
        'class_token': jnp.zeros((1, 1, D), jnp.float32),
        'pos_embedding': nrm(next(ki), (1, S, D), 0.02),
        'ln_g': jnp.ones((1, D), jnp.float32),
        'ln_b': jnp.zeros((1, D), jnp.float32),
        'layers': [],
    }
    for _ in range(num_layers):
        layer = {
            'ln1_g': jnp.ones((1, D), jnp.float32),
            'ln1_b': jnp.zeros((1, D), jnp.float32),
            'w_in': nrm(next(ki), (D, 3 * D), 1.0 / math.sqrt(D)),   # fused q|k|v, (D, 3D)
            'b_in': jnp.zeros((1, 3 * D), jnp.float32),
            'wo': nrm(next(ki), (D, D), 1.0 / math.sqrt(D)),
            'bo': jnp.zeros((1, D), jnp.float32),
            'ln2_g': jnp.ones((1, D), jnp.float32),
            'ln2_b': jnp.zeros((1, D), jnp.float32),
            'w1': nrm(next(ki), (D, M), math.sqrt(2.0 / (D + M))),
            'b1': nrm(next(ki), (1, M), 1e-6),
            'w2': nrm(next(ki), (M, D), math.sqrt(2.0 / (D + M))),
            'b2': nrm(next(ki), (1, D), 1e-6),
        }
        params['layers'].append(layer)
    return params


if __name__ == "__main__":
    # Small ViT: image 16x16, patch 4 -> 16 patches + cls = 17 tokens (padded to 24),
    # hidden 32, mlp 64, 2 layers, 4 heads, batch 2.
    image_size, patch_size = 16, 4
    num_layers, num_heads = 2, 4
    hidden_dim, mlp_dim = 32, 64
    batch = 2

    key = jax.random.PRNGKey(0)
    k_par, k_inp = jax.random.split(key)
    params = init_params(k_par, image_size=image_size, patch_size=patch_size,
                         num_layers=num_layers, hidden_dim=hidden_dim, mlp_dim=mlp_dim)
    x = jax.random.normal(k_inp, (batch, 3, image_size, image_size), dtype=jnp.float32)

    fwd = jax.jit(functools.partial(vit_forward, patch_size=patch_size, num_heads=num_heads))
    out = jax.block_until_ready(fwd(x, params))

    assert out.shape == (batch, hidden_dim), out.shape
    assert bool(jnp.all(jnp.isfinite(out)))
    print("KERNEL_OK")
</pallas_src>

<mosaic_0001>
module attributes {stable_mosaic.version = 11 : i64} {
  func.func @patch_embed_kernel(%arg0: i32, %arg1: memref<32x48xbf16, #tpu.memory_space<vmem>>, %arg2: memref<48x32xbf16, #tpu.memory_space<vmem>>, %arg3: memref<1x32xf32, #tpu.memory_space<vmem>>, %arg4: memref<32x32xf32, #tpu.memory_space<vmem>>) attributes {dimension_semantics = [#tpu.dimension_semantics<parallel>], iteration_bounds = array<i64: 1>, scalar_prefetch = 0 : i64, scratch_operands = 0 : i64, tpu.core_type = #tpu.core_type<tc>, window_params = [{transform_indices = @transform_0, window_bounds = array<i64: 32, 48>}, {pipeline_mode = #tpu.pipeline_mode<synchronous>, transform_indices = @transform_1, window_bounds = array<i64: 48, 32>}, {pipeline_mode = #tpu.pipeline_mode<synchronous>, transform_indices = @transform_2, window_bounds = array<i64: 1, 32>}, {transform_indices = @transform_3, window_bounds = array<i64: 32, 32>}]} {
    %c0 = arith.constant 0 : index
    %c0_0 = arith.constant 0 : index
    %0 = vector.load %arg1[%c0, %c0_0] : memref<32x48xbf16, #tpu.memory_space<vmem>>, vector<32x48xbf16>
    %c0_1 = arith.constant 0 : index
    %c0_2 = arith.constant 0 : index
    %1 = vector.load %arg2[%c0_1, %c0_2] : memref<48x32xbf16, #tpu.memory_space<vmem>>, vector<48x32xbf16>
    %cst = arith.constant dense<0.000000e+00> : vector<32x32xf32>
    %2 = tpu.matmul %0, %1, %cst {dimension_numbers = #tpu.dot_dimension_numbers<[1], [0], [0], [1], [0, 0, 1, 1], [], []>} : vector<32x48xbf16>, vector<48x32xbf16>, vector<32x32xf32> -> vector<32x32xf32>
    %c0_3 = arith.constant 0 : index
    %c0_4 = arith.constant 0 : index
    %3 = vector.load %arg3[%c0_3, %c0_4] : memref<1x32xf32, #tpu.memory_space<vmem>>, vector<1x32xf32>
    %4 = vector.broadcast %3 : vector<1x32xf32> to vector<32x32xf32>
    %5 = arith.addf %2, %4 : vector<32x32xf32>
    %c0_5 = arith.constant 0 : index
    %c0_6 = arith.constant 0 : index
    %6 = vector.load %arg4[%c0_5, %c0_6] : memref<32x32xf32, #tpu.memory_space<vmem>>, vector<32x32xf32>
    tpu.vector_store %arg4[%c0_5, %c0_6], %5 {strides = array<i32>} : memref<32x32xf32, #tpu.memory_space<vmem>>, vector<32x32xf32>,
    return
  }
  func.func @transform_0(%arg0: i32) -> (i32, i32) {
    %c0_i32 = arith.constant 0 : i32
    %c0_i32_0 = arith.constant 0 : i32
    return %arg0, %c0_i32 : i32, i32
  }
  func.func @transform_1(%arg0: i32) -> (i32, i32) {
    %c0_i32 = arith.constant 0 : i32
    %c0_i32_0 = arith.constant 0 : i32
    %c0_i32_1 = arith.constant 0 : i32
    return %c0_i32, %c0_i32_0 : i32, i32
  }
  func.func @transform_2(%arg0: i32) -> (i32, i32) {
    %c0_i32 = arith.constant 0 : i32
    %c0_i32_0 = arith.constant 0 : i32
    %c0_i32_1 = arith.constant 0 : i32
    return %c0_i32, %c0_i32_0 : i32, i32
  }
  func.func @transform_3(%arg0: i32) -> (i32, i32) {
    %c0_i32 = arith.constant 0 : i32
    %c0_i32_0 = arith.constant 0 : i32
    return %arg0, %c0_i32 : i32, i32
  }
}

module attributes {stable_mosaic.version = 11 : i64} {
  func.func @encoder_block_kernel(%arg0: i32, %arg1: memref<1x24x32xbf16, #tpu.memory_space<vmem>>, %arg2: memref<1x24xf32, #tpu.memory_space<vmem>>, %arg3: memref<1x32xf32, #tpu.memory_space<vmem>>, %arg4: memref<1x32xf32, #tpu.memory_space<vmem>>, %arg5: memref<32x96xbf16, #tpu.memory_space<vmem>>, %arg6: memref<1x96xf32, #tpu.memory_space<vmem>>, %arg7: memref<32x32xbf16, #tpu.memory_space<vmem>>, %arg8: memref<1x32xf32, #tpu.memory_space<vmem>>, %arg9: memref<1x32xf32, #tpu.memory_space<vmem>>, %arg10: memref<1x32xf32, #tpu.memory_space<vmem>>, %arg11: memref<32x64xbf16, #tpu.memory_space<vmem>>, %arg12: memref<1x64xf32, #tpu.memory_space<vmem>>, %arg13: memref<64x32xbf16, #tpu.memory_space<vmem>>, %arg14: memref<1x32xf32, #tpu.memory_space<vmem>>, %arg15: memref<1x24x32xbf16, #tpu.memory_space<vmem>>, %arg16: memref<24x32xf32, #tpu.memory_space<vmem>>) attributes {dimension_semantics = [#tpu.dimension_semantics<parallel>], iteration_bounds = array<i64: 2>, scalar_prefetch = 0 : i64, scratch_operands = 1 : i64, tpu.core_type = #tpu.core_type<tc>, window_params = [{transform_indices = @transform_0, window_bounds = array<i64: 1, 24, 32>}, {pipeline_mode = #tpu.pipeline_mode<synchronous>, transform_indices = @transform_1, window_bounds = array<i64: 1, 24>}, {pipeline_mode = #tpu.pipeline_mode<synchronous>, transform_indices = @transform_2, window_bounds = array<i64: 1, 32>}, {pipeline_mode = #tpu.pipeline_mode<synchronous>, transform_indices = @transform_3, window_bounds = array<i64: 1, 32>}, {pipeline_mode = #tpu.pipeline_mode<synchronous>, transform_indices = @transform_4, window_bounds = array<i64: 32, 96>}, {pipeline_mode = #tpu.pipeline_mode<synchronous>, transform_indices = @transform_5, window_bounds = array<i64: 1, 96>}, {pipeline_mode = #tpu.pipeline_mode<synchronous>, transform_indices = @transform_6, window_bounds = array<i64: 32, 32>}, {pipeline_mode = #tpu.pipeline_mode<synchronous>, transform_indices = @transform_7, window_bounds = array<i64: 1, 32>}, {pipeline_mode = #tpu.pipeline_mode<synchronous>, transform_indices = @transform_8, window_bounds = array<i64: 1, 32>}, {pipeline_mode = #tpu.pipeline_mode<synchronous>, transform_indices = @transform_9, window_bounds = array<i64: 1, 32>}, {pipeline_mode = #tpu.pipeline_mode<synchronous>, transform_indices = @transform_10, window_bounds = array<i64: 32, 64>}, {pipeline_mode = #tpu.pipeline_mode<synchronous>, transform_indices = @transform_11, window_bounds = array<i64: 1, 64>}, {pipeline_mode = #tpu.pipeline_mode<synchronous>, transform_indices = @transform_12, window_bounds = array<i64: 64, 32>}, {pipeline_mode = #tpu.pipeline_mode<synchronous>, transform_indices = @transform_13, window_bounds = array<i64: 1, 32>}, {transform_indices = @transform_14, window_bounds = array<i64: 1, 24, 32>}]} {
    %c0 = arith.constant 0 : index
    %c0_0 = arith.constant 0 : index
    %c0_1 = arith.constant 0 : index
    %0 = vector.load %arg1[%c0, %c0_0, %c0_1] : memref<1x24x32xbf16, #tpu.memory_space<vmem>>, vector<1x24x32xbf16>
    %1 = vector.shape_cast %0 : vector<1x24x32xbf16> to vector<24x32xbf16>
    %2 = arith.extf %1 : vector<24x32xbf16> to vector<24x32xf32>
    %c0_2 = arith.constant 0 : index
    %c0_3 = arith.constant 0 : index
    %3 = vector.load %arg3[%c0_2, %c0_3] : memref<1x32xf32, #tpu.memory_space<vmem>>, vector<1x32xf32>
    %c0_4 = arith.constant 0 : index
    %c0_5 = arith.constant 0 : index
    %4 = vector.load %arg4[%c0_4, %c0_5] : memref<1x32xf32, #tpu.memory_space<vmem>>, vector<1x32xf32>
    %cst = arith.constant dense<0.000000e+00> : vector<24xf32>
    %5 = vector.multi_reduction <add>, %2, %cst [1] : vector<24x32xf32> to vector<24xf32>
    %6 = vector.shape_cast %5 : vector<24xf32> to vector<24x1xf32>
    %cst_6 = arith.constant 3.200000e+01 : f32
    %7 = vector.broadcast %cst_6 : f32 to vector<24x1xf32>
    %8 = arith.divf %6, %7 : vector<24x1xf32>
    %9 = vector.broadcast %8 : vector<24x1xf32> to vector<24x32xf32>
    %10 = arith.subf %2, %9 : vector<24x32xf32>
    %11 = arith.mulf %10, %10 : vector<24x32xf32>
    %cst_7 = arith.constant dense<0.000000e+00> : vector<24xf32>
    %12 = vector.multi_reduction <add>, %11, %cst_7 [1] : vector<24x32xf32> to vector<24xf32>
    %13 = vector.shape_cast %12 : vector<24xf32> to vector<24x1xf32>
    %cst_8 = arith.constant 3.200000e+01 : f32
    %14 = vector.broadcast %cst_8 : f32 to vector<24x1xf32>
    %15 = arith.divf %13, %14 : vector<24x1xf32>
    %16 = vector.broadcast %8 : vector<24x1xf32> to vector<24x32xf32>
    %17 = arith.subf %2, %16 : vector<24x32xf32>
    %cst_9 = arith.constant 9.99999997E-7 : f32
    %18 = vector.broadcast %cst_9 : f32 to vector<24x1xf32>
    %19 = arith.addf %15, %18 : vector<24x1xf32>
    %20 = math.rsqrt %19 : vector<24x1xf32>
    %21 = vector.broadcast %20 : vector<24x1xf32> to vector<24x32xf32>
    %22 = arith.mulf %17, %21 : vector<24x32xf32>
    %23 = vector.broadcast %3 : vector<1x32xf32> to vector<24x32xf32>
    %24 = arith.mulf %22, %23 : vector<24x32xf32>
    %25 = vector.broadcast %4 : vector<1x32xf32> to vector<24x32xf32>
    %26 = arith.addf %24, %25 : vector<24x32xf32>
    %27 = arith.truncf %26 : vector<24x32xf32> to vector<24x32xbf16>
    %c0_10 = arith.constant 0 : index
    %c0_11 = arith.constant 0 : index
    %28 = vector.load %arg5[%c0_10, %c0_11] : memref<32x96xbf16, #tpu.memory_space<vmem>>, vector<32x96xbf16>
    %cst_12 = arith.constant dense<0.000000e+00> : vector<24x96xf32>
    %29 = tpu.matmul %27, %28, %cst_12 {dimension_numbers = #tpu.dot_dimension_numbers<[1], [0], [0], [1], [0, 0, 1, 1], [], []>} : vector<24x32xbf16>, vector<32x96xbf16>, vector<24x96xf32> -> vector<24x96xf32>
    %c0_13 = arith.constant 0 : index
    %c0_14 = arith.constant 0 : index
    %30 = vector.load %arg6[%c0_13, %c0_14] : memref<1x96xf32, #tpu.memory_space<vmem>>, vector<1x96xf32>
    %31 = vector.broadcast %30 : vector<1x96xf32> to vector<24x96xf32>
    %32 = arith.addf %29, %31 : vector<24x96xf32>
    %33 = vector.extract_strided_slice %32 {offsets = [0, 0], sizes = [24, 32], strides = [1, 1]} : vector<24x96xf32> to vector<24x32xf32>
    %cst_15 = arith.constant 0.353553385 : f32
    %34 = vector.broadcast %cst_15 : f32 to vector<24x32xf32>
    %35 = arith.mulf %33, %34 : vector<24x32xf32>
    %36 = arith.truncf %35 : vector<24x32xf32> to vector<24x32xbf16>
    %37 = vector.extract_strided_slice %32 {offsets = [0, 32], sizes = [24, 32], strides = [1, 1]} : vector<24x96xf32> to vector<24x32xf32>
    %38 = arith.truncf %37 : vector<24x32xf32> to vector<24x32xbf16>
    %39 = vector.extract_strided_slice %32 {offsets = [0, 64], sizes = [24, 32], strides = [1, 1]} : vector<24x96xf32> to vector<24x32xf32>
    %40 = arith.truncf %39 : vector<24x32xf32> to vector<24x32xbf16>
    %c0_16 = arith.constant 0 : index
    %c0_17 = arith.constant 0 : index
    %41 = vector.load %arg2[%c0_16, %c0_17] : memref<1x24xf32, #tpu.memory_space<vmem>>, vector<1x24xf32>
    %42 = vector.extract_strided_slice %36 {offsets = [0, 0], sizes = [24, 8], strides = [1, 1]} : vector<24x32xbf16> to vector<24x8xbf16>
    %43 = vector.extract_strided_slice %38 {offsets = [0, 0], sizes = [24, 8], strides = [1, 1]} : vector<24x32xbf16> to vector<24x8xbf16>
    %cst_18 = arith.constant dense<0.000000e+00> : vector<24x24xf32>
    %44 = tpu.matmul %42, %43, %cst_18 {dimension_numbers = #tpu.dot_dimension_numbers<[1], [1], [0], [0], [0, 0, 1, 0], [], []>} : vector<24x8xbf16>, vector<24x8xbf16>, vector<24x24xf32> -> vector<24x24xf32>
    %45 = vector.broadcast %41 : vector<1x24xf32> to vector<24x24xf32>
    %46 = arith.addf %44, %45 : vector<24x24xf32>
    %cst_19 = arith.constant dense<0xFF800000> : vector<24xf32>
    %47 = vector.multi_reduction <maximumf>, %46, %cst_19 [1] : vector<24x24xf32> to vector<24xf32>
    %48 = vector.shape_cast %47 : vector<24xf32> to vector<24x1xf32>
    %49 = vector.broadcast %48 : vector<24x1xf32> to vector<24x24xf32>
    %50 = arith.subf %46, %49 : vector<24x24xf32>
    %51 = math.exp %50 : vector<24x24xf32>
    %cst_20 = arith.constant dense<0.000000e+00> : vector<24xf32>
    %52 = vector.multi_reduction <add>, %51, %cst_20 [1] : vector<24x24xf32> to vector<24xf32>
    %53 = vector.shape_cast %52 : vector<24xf32> to vector<24x1xf32>
    %54 = tpu.reciprocal %53 {approx = true} : vector<24x1xf32> -> vector<24x1xf32>
    %55 = vector.broadcast %54 : vector<24x1xf32> to vector<24x24xf32>
    %56 = arith.mulf %51, %55 : vector<24x24xf32>
    %57 = arith.truncf %56 : vector<24x24xf32> to vector<24x24xbf16>
    %58 = vector.extract_strided_slice %40 {offsets = [0, 0], sizes = [24, 8], strides = [1, 1]} : vector<24x32xbf16> to vector<24x8xbf16>
    %cst_21 = arith.constant dense<0.000000e+00> : vector<24x8xf32>
    %59 = tpu.matmul %57, %58, %cst_21 {dimension_numbers = #tpu.dot_dimension_numbers<[1], [0], [0], [1], [0, 0, 1, 1], [], []>} : vector<24x24xbf16>, vector<24x8xbf16>, vector<24x8xf32> -> vector<24x8xf32>
    %c0_22 = arith.constant 0 : index
    %c0_23 = arith.constant 0 : index
    %60 = vector.load %arg16[%c0_22, %c0_23] : memref<24x32xf32, #tpu.memory_space<vmem>>, vector<24x8xf32>
    tpu.vector_store %arg16[%c0_22, %c0_23], %59 {strides = array<i32>} : memref<24x32xf32, #tpu.memory_space<vmem>>, vector<24x8xf32>,
    %61 = vector.extract_strided_slice %36 {offsets = [0, 8], sizes = [24, 8], strides = [1, 1]} : vector<24x32xbf16> to vector<24x8xbf16>
    %62 = vector.extract_strided_slice %38 {offsets = [0, 8], sizes = [24, 8], strides = [1, 1]} : vector<24x32xbf16> to vector<24x8xbf16>
    %cst_24 = arith.constant dense<0.000000e+00> : vector<24x24xf32>
    %63 = tpu.matmul %61, %62, %cst_24 {dimension_numbers = #tpu.dot_dimension_numbers<[1], [1], [0], [0], [0, 0, 1, 0], [], []>} : vector<24x8xbf16>, vector<24x8xbf16>, vector<24x24xf32> -> vector<24x24xf32>
    %64 = vector.broadcast %41 : vector<1x24xf32> to vector<24x24xf32>
    %65 = arith.addf %63, %64 : vector<24x24xf32>
    %cst_25 = arith.constant dense<0xFF800000> : vector<24xf32>
    %66 = vector.multi_reduction <maximumf>, %65, %cst_25 [1] : vector<24x24xf32> to vector<24xf32>
    %67 = vector.shape_cast %66 : vector<24xf32> to vector<24x1xf32>
    %68 = vector.broadcast %67 : vector<24x1xf32> to vector<24x24xf32>
    %69 = arith.subf %65, %68 : vector<24x24xf32>
    %70 = math.exp %69 : vector<24x24xf32>
    %cst_26 = arith.constant dense<0.000000e+00> : vector<24xf32>
    %71 = vector.multi_reduction <add>, %70, %cst_26 [1] : vector<24x24xf32> to vector<24xf32>
    %72 = vector.shape_cast %71 : vector<24xf32> to vector<24x1xf32>
    %73 = tpu.reciprocal %72 {approx = true} : vector<24x1xf32> -> vector<24x1xf32>
    %74 = vector.broadcast %73 : vector<24x1xf32> to vector<24x24xf32>
    %75 = arith.mulf %70, %74 : vector<24x24xf32>
    %76 = arith.truncf %75 : vector<24x24xf32> to vector<24x24xbf16>
    %77 = vector.extract_strided_slice %40 {offsets = [0, 8], sizes = [24, 8], strides = [1, 1]} : vector<24x32xbf16> to vector<24x8xbf16>
    %cst_27 = arith.constant dense<0.000000e+00> : vector<24x8xf32>
    %78 = tpu.matmul %76, %77, %cst_27 {dimension_numbers = #tpu.dot_dimension_numbers<[1], [0], [0], [1], [0, 0, 1, 1], [], []>} : vector<24x24xbf16>, vector<24x8xbf16>, vector<24x8xf32> -> vector<24x8xf32>
    %c0_28 = arith.constant 0 : index
    %c8 = arith.constant 8 : index
    %79 = vector.load %arg16[%c0_28, %c8] : memref<24x32xf32, #tpu.memory_space<vmem>>, vector<24x8xf32>
    tpu.vector_store %arg16[%c0_28, %c8], %78 {strides = array<i32>} : memref<24x32xf32, #tpu.memory_space<vmem>>, vector<24x8xf32>,
    %80 = vector.extract_strided_slice %36 {offsets = [0, 16], sizes = [24, 8], strides = [1, 1]} : vector<24x32xbf16> to vector<24x8xbf16>
    %81 = vector.extract_strided_slice %38 {offsets = [0, 16], sizes = [24, 8], strides = [1, 1]} : vector<24x32xbf16> to vector<24x8xbf16>
    %cst_29 = arith.constant dense<0.000000e+00> : vector<24x24xf32>
    %82 = tpu.matmul %80, %81, %cst_29 {dimension_numbers = #tpu.dot_dimension_numbers<[1], [1], [0], [0], [0, 0, 1, 0], [], []>} : vector<24x8xbf16>, vector<24x8xbf16>, vector<24x24xf32> -> vector<24x24xf32>
    %83 = vector.broadcast %41 : vector<1x24xf32> to vector<24x24xf32>
    %84 = arith.addf %82, %83 : vector<24x24xf32>
    %cst_30 = arith.constant dense<0xFF800000> : vector<24xf32>
    %85 = vector.multi_reduction <maximumf>, %84, %cst_30 [1] : vector<24x24xf32> to vector<24xf32>
    %86 = vector.shape_cast %85 : vector<24xf32> to vector<24x1xf32>
    %87 = vector.broadcast %86 : vector<24x1xf32> to vector<24x24xf32>
    %88 = arith.subf %84, %87 : vector<24x24xf32>
    %89 = math.exp %88 : vector<24x24xf32>
    %cst_31 = arith.constant dense<0.000000e+00> : vector<24xf32>
    %90 = vector.multi_reduction <add>, %89, %cst_31 [1] : vector<24x24xf32> to vector<24xf32>
    %91 = vector.shape_cast %90 : vector<24xf32> to vector<24x1xf32>
    %92 = tpu.reciprocal %91 {approx = true} : vector<24x1xf32> -> vector<24x1xf32>
    %93 = vector.broadcast %92 : vector<24x1xf32> to vector<24x24xf32>
    %94 = arith.mulf %89, %93 : vector<24x24xf32>
    %95 = arith.truncf %94 : vector<24x24xf32> to vector<24x24xbf16>
    %96 = vector.extract_strided_slice %40 {offsets = [0, 16], sizes = [24, 8], strides = [1, 1]} : vector<24x32xbf16> to vector<24x8xbf16>
    %cst_32 = arith.constant dense<0.000000e+00> : vector<24x8xf32>
    %97 = tpu.matmul %95, %96, %cst_32 {dimension_numbers = #tpu.dot_dimension_numbers<[1], [0], [0], [1], [0, 0, 1, 1], [], []>} : vector<24x24xbf16>, vector<24x8xbf16>, vector<24x8xf32> -> vector<24x8xf32>
    %c0_33 = arith.constant 0 : index
    %c16 = arith.constant 16 : index
    %98 = vector.load %arg16[%c0_33, %c16] : memref<24x32xf32, #tpu.memory_space<vmem>>, vector<24x8xf32>
    tpu.vector_store %arg16[%c0_33, %c16], %97 {strides = array<i32>} : memref<24x32xf32, #tpu.memory_space<vmem>>, vector<24x8xf32>,
    %99 = vector.extract_strided_slice %36 {offsets = [0, 24], sizes = [24, 8], strides = [1, 1]} : vector<24x32xbf16> to vector<24x8xbf16>
    %100 = vector.extract_strided_slice %38 {offsets = [0, 24], sizes = [24, 8], strides = [1, 1]} : vector<24x32xbf16> to vector<24x8xbf16>
    %cst_34 = arith.constant dense<0.000000e+00> : vector<24x24xf32>
    %101 = tpu.matmul %99, %100, %cst_34 {dimension_numbers = #tpu.dot_dimension_numbers<[1], [1], [0], [0], [0, 0, 1, 0], [], []>} : vector<24x8xbf16>, vector<24x8xbf16>, vector<24x24xf32> -> vector<24x24xf32>
    %102 = vector.broadcast %41 : vector<1x24xf32> to vector<24x24xf32>
    %103 = arith.addf %101, %102 : vector<24x24xf32>
    %cst_35 = arith.constant dense<0xFF800000> : vector<24xf32>
    %104 = vector.multi_reduction <maximumf>, %103, %cst_35 [1] : vector<24x24xf32> to vector<24xf32>
    %105 = vector.shape_cast %104 : vector<24xf32> to vector<24x1xf32>
    %106 = vector.broadcast %105 : vector<24x1xf32> to vector<24x24xf32>
    %107 = arith.subf %103, %106 : vector<24x24xf32>
    %108 = math.exp %107 : vector<24x24xf32>
    %cst_36 = arith.constant dense<0.000000e+00> : vector<24xf32>
    %109 = vector.multi_reduction <add>, %108, %cst_36 [1] : vector<24x24xf32> to vector<24xf32>
    %110 = vector.shape_cast %109 : vector<24xf32> to vector<24x1xf32>
    %111 = tpu.reciprocal %110 {approx = true} : vector<24x1xf32> -> vector<24x1xf32>
    %112 = vector.broadcast %111 : vector<24x1xf32> to vector<24x24xf32>
    %113 = arith.mulf %108, %112 : vector<24x24xf32>
    %114 = arith.truncf %113 : vector<24x24xf32> to vector<24x24xbf16>
    %115 = vector.extract_strided_slice %40 {offsets = [0, 24], sizes = [24, 8], strides = [1, 1]} : vector<24x32xbf16> to vector<24x8xbf16>
    %cst_37 = arith.constant dense<0.000000e+00> : vector<24x8xf32>
    %116 = tpu.matmul %114, %115, %cst_37 {dimension_numbers = #tpu.dot_dimension_numbers<[1], [0], [0], [1], [0, 0, 1, 1], [], []>} : vector<24x24xbf16>, vector<24x8xbf16>, vector<24x8xf32> -> vector<24x8xf32>
    %c0_38 = arith.constant 0 : index
    %c24 = arith.constant 24 : index
    %117 = vector.load %arg16[%c0_38, %c24] : memref<24x32xf32, #tpu.memory_space<vmem>>, vector<24x8xf32>
    tpu.vector_store %arg16[%c0_38, %c24], %116 {strides = array<i32>} : memref<24x32xf32, #tpu.memory_space<vmem>>, vector<24x8xf32>,
    %c0_39 = arith.constant 0 : index
    %c0_40 = arith.constant 0 : index
    %118 = vector.load %arg16[%c0_39, %c0_40] : memref<24x32xf32, #tpu.memory_space<vmem>>, vector<24x32xf32>
    %119 = arith.truncf %118 : vector<24x32xf32> to vector<24x32xbf16>
    %c0_41 = arith.constant 0 : index
    %c0_42 = arith.constant 0 : index
    %120 = vector.load %arg7[%c0_41, %c0_42] : memref<32x32xbf16, #tpu.memory_space<vmem>>, vector<32x32xbf16>
    %cst_43 = arith.constant dense<0.000000e+00> : vector<24x32xf32>
    %121 = tpu.matmul %119, %120, %cst_43 {dimension_numbers = #tpu.dot_dimension_numbers<[1], [0], [0], [1], [0, 0, 1, 1], [], []>} : vector<24x32xbf16>, vector<32x32xbf16>, vector<24x32xf32> -> vector<24x32xf32>
    %c0_44 = arith.constant 0 : index
    %c0_45 = arith.constant 0 : index
    %122 = vector.load %arg8[%c0_44, %c0_45] : memref<1x32xf32, #tpu.memory_space<vmem>>, vector<1x32xf32>
    %123 = vector.broadcast %122 : vector<1x32xf32> to vector<24x32xf32>
    %124 = arith.addf %121, %123 : vector<24x32xf32>
    %125 = arith.addf %2, %124 : vector<24x32xf32>
    %c0_46 = arith.constant 0 : index
    %c0_47 = arith.constant 0 : index
    %126 = vector.load %arg9[%c0_46, %c0_47] : memref<1x32xf32, #tpu.memory_space<vmem>>, vector<1x32xf32>
    %c0_48 = arith.constant 0 : index
    %c0_49 = arith.constant 0 : index
    %127 = vector.load %arg10[%c0_48, %c0_49] : memref<1x32xf32, #tpu.memory_space<vmem>>, vector<1x32xf32>
    %cst_50 = arith.constant dense<0.000000e+00> : vector<24xf32>
    %128 = vector.multi_reduction <add>, %125, %cst_50 [1] : vector<24x32xf32> to vector<24xf32>
    %129 = vector.shape_cast %128 : vector<24xf32> to vector<24x1xf32>
    %cst_51 = arith.constant 3.200000e+01 : f32
    %130 = vector.broadcast %cst_51 : f32 to vector<24x1xf32>
    %131 = arith.divf %129, %130 : vector<24x1xf32>
    %132 = vector.broadcast %131 : vector<24x1xf32> to vector<24x32xf32>
    %133 = arith.subf %125, %132 : vector<24x32xf32>
    %134 = arith.mulf %133, %133 : vector<24x32xf32>
    %cst_52 = arith.constant dense<0.000000e+00> : vector<24xf32>
    %135 = vector.multi_reduction <add>, %134, %cst_52 [1] : vector<24x32xf32> to vector<24xf32>
    %136 = vector.shape_cast %135 : vector<24xf32> to vector<24x1xf32>
    %cst_53 = arith.constant 3.200000e+01 : f32
    %137 = vector.broadcast %cst_53 : f32 to vector<24x1xf32>
    %138 = arith.divf %136, %137 : vector<24x1xf32>
    %139 = vector.broadcast %131 : vector<24x1xf32> to vector<24x32xf32>
    %140 = arith.subf %125, %139 : vector<24x32xf32>
    %cst_54 = arith.constant 9.99999997E-7 : f32
    %141 = vector.broadcast %cst_54 : f32 to vector<24x1xf32>
    %142 = arith.addf %138, %141 : vector<24x1xf32>
    %143 = math.rsqrt %142 : vector<24x1xf32>
    %144 = vector.broadcast %143 : vector<24x1xf32> to vector<24x32xf32>
    %145 = arith.mulf %140, %144 : vector<24x32xf32>
    %146 = vector.broadcast %126 : vector<1x32xf32> to vector<24x32xf32>
    %147 = arith.mulf %145, %146 : vector<24x32xf32>
    %148 = vector.broadcast %127 : vector<1x32xf32> to vector<24x32xf32>
    %149 = arith.addf %147, %148 : vector<24x32xf32>
    %150 = arith.truncf %149 : vector<24x32xf32> to vector<24x32xbf16>
    %c0_55 = arith.constant 0 : index
    %c0_56 = arith.constant 0 : index
    %151 = vector.load %arg11[%c0_55, %c0_56] : memref<32x64xbf16, #tpu.memory_space<vmem>>, vector<32x64xbf16>
    %cst_57 = arith.constant dense<0.000000e+00> : vector<24x64xf32>
    %152 = tpu.matmul %150, %151, %cst_57 {dimension_numbers = #tpu.dot_dimension_numbers<[1], [0], [0], [1], [0, 0, 1, 1], [], []>} : vector<24x32xbf16>, vector<32x64xbf16>, vector<24x64xf32> -> vector<24x64xf32>
    %c0_58 = arith.constant 0 : index
    %c0_59 = arith.constant 0 : index
    %153 = vector.load %arg12[%c0_58, %c0_59] : memref<1x64xf32, #tpu.memory_space<vmem>>, vector<1x64xf32>
    %154 = vector.broadcast %153 : vector<1x64xf32> to vector<24x64xf32>
    %155 = arith.addf %152, %154 : vector<24x64xf32>
    %cst_60 = arith.constant 5.000000e-01 : f32
    %156 = vector.broadcast %cst_60 : f32 to vector<24x64xf32>
    %157 = arith.mulf %156, %155 : vector<24x64xf32>
    %cst_61 = arith.constant 4.471500e-02 : f32
    %158 = vector.broadcast %cst_61 : f32 to vector<24x64xf32>
    %159 = arith.mulf %158, %155 : vector<24x64xf32>
    %160 = arith.mulf %159, %155 : vector<24x64xf32>
    %161 = arith.mulf %160, %155 : vector<24x64xf32>
    %162 = arith.addf %155, %161 : vector<24x64xf32>
    %cst_62 = arith.constant 0.797884583 : f32
    %163 = vector.broadcast %cst_62 : f32 to vector<24x64xf32>
    %164 = arith.mulf %163, %162 : vector<24x64xf32>
    %165 = math.tanh %164 : vector<24x64xf32>
    %cst_63 = arith.constant 1.000000e+00 : f32
    %166 = vector.broadcast %cst_63 : f32 to vector<24x64xf32>
    %167 = arith.addf %166, %165 : vector<24x64xf32>
    %168 = arith.mulf %157, %167 : vector<24x64xf32>
    %169 = arith.truncf %168 : vector<24x64xf32> to vector<24x64xbf16>
    %c0_64 = arith.constant 0 : index
    %c0_65 = arith.constant 0 : index
    %170 = vector.load %arg13[%c0_64, %c0_65] : memref<64x32xbf16, #tpu.memory_space<vmem>>, vector<64x32xbf16>
    %cst_66 = arith.constant dense<0.000000e+00> : vector<24x32xf32>
    %171 = tpu.matmul %169, %170, %cst_66 {dimension_numbers = #tpu.dot_dimension_numbers<[1], [0], [0], [1], [0, 0, 1, 1], [], []>} : vector<24x64xbf16>, vector<64x32xbf16>, vector<24x32xf32> -> vector<24x32xf32>
    %c0_67 = arith.constant 0 : index
    %c0_68 = arith.constant 0 : index
    %172 = vector.load %arg14[%c0_67, %c0_68] : memref<1x32xf32, #tpu.memory_space<vmem>>, vector<1x32xf32>
    %173 = vector.broadcast %172 : vector<1x32xf32> to vector<24x32xf32>
    %174 = arith.addf %171, %173 : vector<24x32xf32>
    %175 = arith.addf %125, %174 : vector<24x32xf32>
    %176 = arith.truncf %175 : vector<24x32xf32> to vector<24x32xbf16>
    %c0_69 = arith.constant 0 : index
    %c0_70 = arith.constant 0 : index
    %c0_71 = arith.constant 0 : index
    %177 = vector.load %arg15[%c0_69, %c0_70, %c0_71] : memref<1x24x32xbf16, #tpu.memory_space<vmem>>, vector<1x24x32xbf16>
    %178 = vector.shape_cast %177 : vector<1x24x32xbf16> to vector<24x32xbf16>
    %179 = vector.shape_cast %176 : vector<24x32xbf16> to vector<1x24x32xbf16>
    tpu.vector_store %arg15[%c0_69, %c0_70, %c0_71], %179 {strides = array<i32>} : memref<1x24x32xbf16, #tpu.memory_space<vmem>>, vector<1x24x32xbf16>,
    return
  }
  func.func @transform_0(%arg0: i32) -> (i32, i32, i32) {
    %c0_i32 = arith.constant 0 : i32
    %c0_i32_0 = arith.constant 0 : i32
    %c0_i32_1 = arith.constant 0 : i32
    return %arg0, %c0_i32, %c0_i32_0 : i32, i32, i32
  }
  func.func @transform_1(%arg0: i32) -> (i32, i32) {
    %c0_i32 = arith.constant 0 : i32
    %c0_i32_0 = arith.constant 0 : i32
    %c0_i32_1 = arith.constant 0 : i32
    return %c0_i32, %c0_i32_0 : i32, i32
  }
  func.func @transform_2(%arg0: i32) -> (i32, i32) {
    %c0_i32 = arith.constant 0 : i32
    %c0_i32_0 = arith.constant 0 : i32
    %c0_i32_1 = arith.constant 0 : i32
    return %c0_i32, %c0_i32_0 : i32, i32
  }
  func.func @transform_3(%arg0: i32) -> (i32, i32) {
    %c0_i32 = arith.constant 0 : i32
    %c0_i32_0 = arith.constant 0 : i32
    %c0_i32_1 = arith.constant 0 : i32
    return %c0_i32, %c0_i32_0 : i32, i32
  }
  func.func @transform_4(%arg0: i32) -> (i32, i32) {
    %c0_i32 = arith.constant 0 : i32
    %c0_i32_0 = arith.constant 0 : i32
    %c0_i32_1 = arith.constant 0 : i32
    return %c0_i32, %c0_i32_0 : i32, i32
  }
  func.func @transform_5(%arg0: i32) -> (i32, i32) {
    %c0_i32 = arith.constant 0 : i32
    %c0_i32_0 = arith.constant 0 : i32
    %c0_i32_1 = arith.constant 0 : i32
    return %c0_i32, %c0_i32_0 : i32, i32
  }
  func.func @transform_6(%arg0: i32) -> (i32, i32) {
    %c0_i32 = arith.constant 0 : i32
    %c0_i32_0 = arith.constant 0 : i32
    %c0_i32_1 = arith.constant 0 : i32
    return %c0_i32, %c0_i32_0 : i32, i32
  }
  func.func @transform_7(%arg0: i32) -> (i32, i32) {
    %c0_i32 = arith.constant 0 : i32
    %c0_i32_0 = arith.constant 0 : i32
    %c0_i32_1 = arith.constant 0 : i32
    return %c0_i32, %c0_i32_0 : i32, i32
  }
  func.func @transform_8(%arg0: i32) -> (i32, i32) {
    %c0_i32 = arith.constant 0 : i32
    %c0_i32_0 = arith.constant 0 : i32
    %c0_i32_1 = arith.constant 0 : i32
    return %c0_i32, %c0_i32_0 : i32, i32
  }
  func.func @transform_9(%arg0: i32) -> (i32, i32) {
    %c0_i32 = arith.constant 0 : i32
    %c0_i32_0 = arith.constant 0 : i32
    %c0_i32_1 = arith.constant 0 : i32
    return %c0_i32, %c0_i32_0 : i32, i32
  }
  func.func @transform_10(%arg0: i32) -> (i32, i32) {
    %c0_i32 = arith.constant 0 : i32
    %c0_i32_0 = arith.constant 0 : i32
    %c0_i32_1 = arith.constant 0 : i32
    return %c0_i32, %c0_i32_0 : i32, i32
  }
  func.func @transform_11(%arg0: i32) -> (i32, i32) {
    %c0_i32 = arith.constant 0 : i32
    %c0_i32_0 = arith.constant 0 : i32
    %c0_i32_1 = arith.constant 0 : i32
    return %c0_i32, %c0_i32_0 : i32, i32
  }
  func.func @transform_12(%arg0: i32) -> (i32, i32) {
    %c0_i32 = arith.constant 0 : i32
    %c0_i32_0 = arith.constant 0 : i32
    %c0_i32_1 = arith.constant 0 : i32
    return %c0_i32, %c0_i32_0 : i32, i32
  }
  func.func @transform_13(%arg0: i32) -> (i32, i32) {
    %c0_i32 = arith.constant 0 : i32
    %c0_i32_0 = arith.constant 0 : i32
    %c0_i32_1 = arith.constant 0 : i32
    return %c0_i32, %c0_i32_0 : i32, i32
  }
  func.func @transform_14(%arg0: i32) -> (i32, i32, i32) {
    %c0_i32 = arith.constant 0 : i32
    %c0_i32_0 = arith.constant 0 : i32
    %c0_i32_1 = arith.constant 0 : i32
    return %arg0, %c0_i32, %c0_i32_0 : i32, i32, i32
  }
}

module attributes {stable_mosaic.version = 11 : i64} {
  func.func @final_ln_kernel(%arg0: i32, %arg1: memref<2x32xbf16, #tpu.memory_space<vmem>>, %arg2: memref<1x32xf32, #tpu.memory_space<vmem>>, %arg3: memref<1x32xf32, #tpu.memory_space<vmem>>, %arg4: memref<2x32xf32, #tpu.memory_space<vmem>>) attributes {dimension_semantics = [#tpu.dimension_semantics<parallel>], iteration_bounds = array<i64: 1>, scalar_prefetch = 0 : i64, scratch_operands = 0 : i64, tpu.core_type = #tpu.core_type<tc>, window_params = [{transform_indices = @transform_0, window_bounds = array<i64: 2, 32>}, {pipeline_mode = #tpu.pipeline_mode<synchronous>, transform_indices = @transform_1, window_bounds = array<i64: 1, 32>}, {pipeline_mode = #tpu.pipeline_mode<synchronous>, transform_indices = @transform_2, window_bounds = array<i64: 1, 32>}, {transform_indices = @transform_3, window_bounds = array<i64: 2, 32>}]} {
    %c0 = arith.constant 0 : index
    %c0_0 = arith.constant 0 : index
    %0 = vector.load %arg1[%c0, %c0_0] : memref<2x32xbf16, #tpu.memory_space<vmem>>, vector<2x32xbf16>
    %1 = arith.extf %0 : vector<2x32xbf16> to vector<2x32xf32>
    %c0_1 = arith.constant 0 : index
    %c0_2 = arith.constant 0 : index
    %2 = vector.load %arg2[%c0_1, %c0_2] : memref<1x32xf32, #tpu.memory_space<vmem>>, vector<1x32xf32>
    %c0_3 = arith.constant 0 : index
    %c0_4 = arith.constant 0 : index
    %3 = vector.load %arg3[%c0_3, %c0_4] : memref<1x32xf32, #tpu.memory_space<vmem>>, vector<1x32xf32>
    %cst = arith.constant dense<0.000000e+00> : vector<2xf32>
    %4 = vector.multi_reduction <add>, %1, %cst [1] : vector<2x32xf32> to vector<2xf32>
    %5 = vector.shape_cast %4 : vector<2xf32> to vector<2x1xf32>
    %cst_5 = arith.constant 3.200000e+01 : f32
    %6 = vector.broadcast %cst_5 : f32 to vector<2x1xf32>
    %7 = arith.divf %5, %6 : vector<2x1xf32>
    %8 = vector.broadcast %7 : vector<2x1xf32> to vector<2x32xf32>
    %9 = arith.subf %1, %8 : vector<2x32xf32>
    %10 = arith.mulf %9, %9 : vector<2x32xf32>
    %cst_6 = arith.constant dense<0.000000e+00> : vector<2xf32>
    %11 = vector.multi_reduction <add>, %10, %cst_6 [1] : vector<2x32xf32> to vector<2xf32>
    %12 = vector.shape_cast %11 : vector<2xf32> to vector<2x1xf32>
    %cst_7 = arith.constant 3.200000e+01 : f32
    %13 = vector.broadcast %cst_7 : f32 to vector<2x1xf32>
    %14 = arith.divf %12, %13 : vector<2x1xf32>
    %15 = vector.broadcast %7 : vector<2x1xf32> to vector<2x32xf32>
    %16 = arith.subf %1, %15 : vector<2x32xf32>
    %cst_8 = arith.constant 9.99999997E-7 : f32
    %17 = vector.broadcast %cst_8 : f32 to vector<2x1xf32>
    %18 = arith.addf %14, %17 : vector<2x1xf32>
    %19 = math.rsqrt %18 : vector<2x1xf32>
    %20 = vector.broadcast %19 : vector<2x1xf32> to vector<2x32xf32>
    %21 = arith.mulf %16, %20 : vector<2x32xf32>
    %22 = vector.broadcast %2 : vector<1x32xf32> to vector<2x32xf32>
    %23 = arith.mulf %21, %22 : vector<2x32xf32>
    %24 = vector.broadcast %3 : vector<1x32xf32> to vector<2x32xf32>
    %25 = arith.addf %23, %24 : vector<2x32xf32>
    %c0_9 = arith.constant 0 : index
    %c0_10 = arith.constant 0 : index
    %26 = vector.load %arg4[%c0_9, %c0_10] : memref<2x32xf32, #tpu.memory_space<vmem>>, vector<2x32xf32>
    tpu.vector_store %arg4[%c0_9, %c0_10], %25 {strides = array<i32>} : memref<2x32xf32, #tpu.memory_space<vmem>>, vector<2x32xf32>,
    return
  }
  func.func @transform_0(%arg0: i32) -> (i32, i32) {
    %c0_i32 = arith.constant 0 : i32
    %c0_i32_0 = arith.constant 0 : i32
    return %arg0, %c0_i32 : i32, i32
  }
  func.func @transform_1(%arg0: i32) -> (i32, i32) {
    %c0_i32 = arith.constant 0 : i32
    %c0_i32_0 = arith.constant 0 : i32
    %c0_i32_1 = arith.constant 0 : i32
    return %c0_i32, %c0_i32_0 : i32, i32
  }
  func.func @transform_2(%arg0: i32) -> (i32, i32) {
    %c0_i32 = arith.constant 0 : i32
    %c0_i32_0 = arith.constant 0 : i32
    %c0_i32_1 = arith.constant 0 : i32
    return %c0_i32, %c0_i32_0 : i32, i32
  }
  func.func @transform_3(%arg0: i32) -> (i32, i32) {
    %c0_i32 = arith.constant 0 : i32
    %c0_i32_0 = arith.constant 0 : i32
    return %arg0, %c0_i32 : i32, i32
  }
}

</mosaic_0001>

<bundles_post_ra>
// kernel: vit_forward.4
= control target key start
LH: loop header
LB: loop body
LE: loop exit
PB: predicated region body
PF: predicated region fallthrough
CT: control target
= control target key end

     0   :  { %vm57_vm0 = vcmask 392192   ;;  %vm83_vm1 = vcmask 261120   ;;  %s173_s1 = inlined_call_operand.vmem [shape: bf16[48,32], index: 1, kind: input, shape index: {}]   ;;  %s174_s2 = inlined_call_operand.vmem [shape: f32[1,32], index: 2, kind: input, shape index: {}]   ;;  %s175_s0 = inlined_call_operand.vmem [shape: bf16[32,48], index: 0, kind: input, shape index: {}]   ;;  %s176_s3 = inlined_call_operand.vmem [shape: f32[32,32], index: 3, kind: output, shape index: {}]  }
   0x1   :  { %v118_v0 = vld [vmem:[%s173_s1 + $0x10] sm:$0xff]  ;;  %v117_v1 = vld [vmem:[%s173_s1 + $0x8] sm:$0xff]  ;;  %v116_v2 = vld [vmem:[%s173_s1] sm:$0xff] }
   0x2   :  { %69 = vmatpush.bf16.msra.mxu0 %v118_v0  ;;  %119 = vmatpush.bf16.msra.mxu1 %v118_v0  ;;  %v114_v3 = vld [vmem:[%s175_s0] sm:$0xff]  ;;  %v115_v4 = vld [vmem:[%s175_s0 + $0x8] sm:$0xff] }
   0x3   :  { %v122_v5 = vld [vmem:[%s174_s2] ss:$0 sm:$0xff] }
   0x6   :  { %70 = vmatpush.bf16.msra.mxu0 %v117_v1  ;;  %120 = vmatpush.bf16.msra.mxu1 %v117_v1 }
   0xa   :  { %71 = vmatpush.bf16.msra.mxu0 %v116_v2  ;;  %121 = vmatpush.bf16.msra.mxu1 %v116_v2 }
   0xd   :  { %112 = vmatmul.msk.bf16.vlgmr.msra.gmra.mxu0 %vm57_vm0, %v114_v3  ;;  %113 = vmatmul.msk.bf16.vlgmr.msra.gmra.mxu1 %vm57_vm0, %v115_v4 }
  0x8a   :  { %v73_v6 = vpop.f32.mrf.mxu0  ;;  %v78_v7 = vpop.f32.mrf.mxu1 }
  0x8b   :  { %v74_v8 = vadd.f32 %v122_v5, %v73_v6  ;;  %v79_v9 = vadd.f32 %v122_v5, %v78_v7 }
  0x8d   :  { %84 = vst.msk [vmem:[%s176_s3] sm:$0xff] %vm83_vm1, %v74_v8 }
  0x8e   :  { %86 = vst.msk [vmem:[%s176_s3 + $0x10] sm:$0xff] %vm83_vm1, %v79_v9 }
  0x92   :  { %v75_v10 = vpop.f32.mrf.mxu0  ;;  %v80_v11 = vpop.f32.mrf.mxu1 }
  0x93   :  { %v76_v12 = vadd.f32 %v122_v5, %v75_v10  ;;  %v81_v13 = vadd.f32 %v122_v5, %v80_v11 }
  0x95   :  { %85 = vst.msk [vmem:[%s176_s3 + $0x8] sm:$0xff] %vm83_vm1, %v76_v12 }
  0x96   :  { %87 = vst.msk [vmem:[%s176_s3 + $0x18] sm:$0xff] %vm83_vm1, %v81_v13 }

// kernel: vit_forward.7
= control target key start
LH: loop header
LB: loop body
LE: loop exit
PB: predicated region body
PF: predicated region fallthrough
CT: control target
= control target key end

     0   :  { %vm19_vm0 = vcmask 254976   ;;  %s145_s0 = inlined_call_operand.vmem [shape: bf16[2,32], index: 0, kind: input, shape index: {}]   ;;  %s146_s1 = inlined_call_operand.vmem [shape: f32[1,32], index: 1, kind: input, shape index: {}]   ;;  %s147_s2 = inlined_call_operand.vmem [shape: f32[1,32], index: 2, kind: input, shape index: {}]   ;;  %s148_s3 = inlined_call_operand.hbm [shape: f32[2,32], index: 3, kind: output, shape index: {}]  }
   0x1   :  { %v15_v0 = vld [vmem:[%s145_s0] sm:$0x1] }
   0x2   :  { %8 = vsyncpa [#allocation3], 0  ;;  %v16_v1 = vunpack.c.l.bf16 %v15_v0  ;;  %v108_v3 = vmov 32.0   ;;  %v76_v24 = vld [vmem:[%s146_s1] ss:$0 sm:$0xff]  ;;  %s109_s17 = smov [#allocation2]  }
   0x3   :  { %78 = vrcp.f32 %v108_v3  ;;  %v77_v27 = vld [vmem:[%s147_s2] ss:$0 sm:$0xff]  ;;  %s63_s18 = sshll.u32 %s109_s17, 4  ;;  %s65_s21 = sshll.u32 %s148_s3, 4  ;;  %s64_s18 = int_to_ptr.vmem [resolvable:$true] %s63_s18  ;;  %s66_s21 = int_to_ptr.hbm [resolvable:$true] %s65_s21 }
   0x4   :  { %v20_v2 = vsel %vm19_vm0, %v16_v1, 0.0 }
   0x5   :  { %21 = vadd.xlane.f32.xlu0 %v20_v2 }
   0x9   :  { %v79_v4 = vpop.eup %78 }
   0xa   :  { %v24_v5 = vmul.f32 32.0, %v79_v4  ;;  %vm28_vm1 = vweird.f32 %v79_v4 }
   0xc   :  { %v25_v6 = vsub.f32 1.0, %v24_v5 }
   0xe   :  { %v26_v7 = vmul.f32 %v79_v4, %v25_v6 }
  0x10   :  { %v27_v8 = vadd.f32 %v79_v4, %v26_v7 }
  0x12   :  { %v29_v9 = vsel %vm28_vm1, %v79_v4, %v27_v8 }
  0x78   :  { %v22_v10 = vpop.xlane.xlu0 %21 }
  0x79   :  { %v30_v11 = vmul.f32 %v29_v9, %v22_v10 }
  0x7b   :  { %v31_v12 = vsub.f32 %v16_v1, %v30_v11 }
  0x7d   :  { %v32_v13 = vmul.f32 %v31_v12, %v31_v12 }
  0x7f   :  { %v33_v14 = vsel %vm19_vm0, %v32_v13, 0.0 }
  0x80   :  { %34 = vadd.xlane.f32.xlu0 %v33_v14 }
  0xf3   :  { %v35_v15 = vpop.xlane.xlu0 %34 }
  0xf4   :  { %v36_v16 = vmul.f32 %v35_v15, %v29_v9 }
  0xf6   :  { %v37_v17 = vadd.f32 1e-06, %v36_v16 }
  0xf8   :  { %80 = vrsqrt.f32 %v37_v17  ;;  %vm44_vm3 = vweird.f32 %v37_v17 }
  0xfe   :  { %v81_v18 = vpop.eup %80 }
  0xff   :  { %v39_v19 = vmul.f32 %v81_v18, %v37_v17  ;;  %vm45_vm2 = vweird.f32 %v81_v18 }
 0x100   :  { %vm46_vm4 = vmor %vm44_vm3, %vm45_vm2 }
 0x101   :  { %v40_v20 = vmul.f32 %v81_v18, %v39_v19 }
 0x103   :  { %v41_v21 = vmul.f32 0.5, %v40_v20 }
 0x105   :  { %v42_v22 = vsub.f32 1.5, %v41_v21 }
 0x107   :  { %v43_v23 = vmul.f32 %v81_v18, %v42_v22 }
 0x109   :  { %v47_v25 = vsel %vm46_vm4, %v81_v18, %v43_v23 }
 0x10a   :  { %v48_v26 = vmul.f32 %v47_v25, %v31_v12 }
 0x10c   :  { %v52_v28 = vmul.f32 %v76_v24, %v48_v26 }
 0x10e   :  { %v56_v29 = vadd.f32 %v77_v27, %v52_v28 }
 0x110   :  { %57 = vst.msk [vmem:[#allocation2] sm:$0x3] %vm19_vm0, %v56_v29 }
 0x111   :  { %68 = dma.vmem_to_hbm [thread:$0]  %s64_s18, 32, %s66_s21, [#allocation3]  }
 0x112   :  { %106 = dma.done.wait [#allocation3], 32  }
 0x113   :  { %107 = vsyncadd [#allocation3], 4294967264 }
 0x114   :  { %73 = vsyncpa [#allocation3], 1 }

// kernel: vit_forward.5
= control target key start
LH: loop header
LB: loop body
LE: loop exit
PB: predicated region body
PF: predicated region fallthrough
CT: control target
= control target key end

     0   :  { %s1727_s29 = smov 0   ;;  %s2004_s0 = inlined_call_operand.vmem [shape: bf16[2,24,32], index: 0, kind: input, shape index: {}]   ;;  %s2005_s1 = inlined_call_operand.vmem [shape: f32[1,24], index: 1, kind: input, shape index: {}]   ;;  %s2006_s2 = inlined_call_operand.vmem [shape: f32[1,32], index: 2, kind: input, shape index: {}]   ;;  %s2007_s3 = inlined_call_operand.vmem [shape: f32[1,32], index: 3, kind: input, shape index: {}]   ;;  %s2008_s4 = inlined_call_operand.vmem [shape: bf16[32,96], index: 4, kind: input, shape index: {}]   ;;  %s2009_s5 = inlined_call_operand.vmem [shape: f32[1,96], index: 5, kind: input, shape index: {}]   ;;  %s2010_s6 = inlined_call_operand.vmem [shape: bf16[32,32], index: 6, kind: input, shape index: {}]   ;;  %s2011_s7 = inlined_call_operand.vmem [shape: f32[1,32], index: 7, kind: input, shape index: {}]   ;;  %s2012_s8 = inlined_call_operand.vmem [shape: f32[1,32], index: 8, kind: input, shape index: {}]   ;;  %s2013_s9 = inlined_call_operand.vmem [shape: f32[1,32], index: 9, kind: input, shape index: {}]   ;;  %s2014_s10 = inlined_call_operand.vmem [shape: bf16[32,64], index: 10, kind: input, shape index: {}]   ;;  %s2015_s11 = inlined_call_operand.vmem [shape: f32[1,64], index: 11, kind: input, shape index: {}]   ;;  %s2016_s12 = inlined_call_operand.vmem [shape: bf16[64,32], index: 12, kind: input, shape index: {}]   ;;  %s2017_s13 = inlined_call_operand.vmem [shape: f32[1,32], index: 13, kind: input, shape index: {}]   ;;  %s2018_s14 = inlined_call_operand.vmem [shape: bf16[2,24,32], index: 14, kind: output, shape index: {}]  }
   0x1 LB: > { %s1441_s30 = sadd.s32 4294967295, %s1635_s29   ;;  %p1445_p0 = scmp.ge.s32.totalorder %s1635_s29, 1  ;;  %s1635_s29 = sphi %s1727_s29, %s24_s29  }
   0x2   : > { %p412_p1 = scmp.lt.s32.totalorder %s1635_s29, 3 }
   0x4   : > { %p413_p2 = pnand %p1445_p0, %p412_p1 }
   0x5   : > { %p458_p3 = scmp.lt.s32.totalorder (!%p413_p2), %s1441_s30, 1  ;;  %s1638_s16 = smov (!%p413_p2), 96  }
   0x6   : > { %416 = sbr.rel (%p413_p2) target bundleno = 2523 (0x9db), region = 76  ;;  %s1639_s17 = smov (!%p413_p2), 88  }
   0x7   : > { %s1641_s19 = smov (!%p413_p2), 120   ;;  %s1642_s22 = smov (!%p413_p2), 80  }
   0x8   : > { %s1643_s23 = smov (!%p413_p2), 72   ;;  %s1644_s24 = smov (!%p413_p2), 104  }
   0x9   : > { %s1645_s25 = smov (!%p413_p2), 112   ;;  %s1646_s26 = smov (!%p413_p2), 56  }
   0xa   : > { %s1647_s27 = smov (!%p413_p2), 48   ;;  %s1648_s28 = smov (!%p413_p2), 40  }
   0xb   : > { %s2020_s30 = smov (!%p458_p3, %s1441_s30), 1  ;;  %vm477_vm0 = vcmask 261120   ;;  %v1637_v8 = vmov 32.0   ;;  %v1515_v30 = vld [vmem:[%s2008_s4 + $0x8] sm:$0xff]  ;;  %v1514_v33 = vld [vmem:[%s2008_s4] sm:$0xff]  ;;  %vm642_vm11 = vcmask 64512  }
   0xc   : > { %s1528_s15 = smul.u32 12, %s2020_s30  ;;  %1561 = vrcp.f32 %v1637_v8  ;;  %597 = vmatpush.bf16.msra.mxu0 %v1515_v30  ;;  %v1552_v55 = vld [vmem:[%s2006_s2] ss:$0 sm:$0xff]  ;;  %vm720_vm12 = vcmask 1043456   ;;  %vm673_vm13 = vcmask 195584   ;;  %vm862_vm14 = vcmask 130112  }
   0xd   : > { %v1553_v62 = vld [vmem:[%s2007_s3] ss:$0 sm:$0xff]  ;;  %vm983_vm15 = vcmask 195712  }
   0xe   : > { %s462_s18 = scalar_lea.vmem %s2004_s0, %s1528_s15  ;;  %s467_s21 = scalar_lea.vmem %s2018_s14, %s1528_s15 }
   0xf   : > { %v1525_v0 = vld [vmem:[%s462_s18] sm:$0xff]   ;;  %v471_v1 = vld [vmem:[%s462_s18 + $0x8] sm:$0xf]  ;;  %s1640_s18 = smov 64  }
  0x10   : > { %v1743_v2 = vunpack.c.l.bf16 %v1525_v0  ;;  %v1745_v3 = vunpack.c.l.bf16 %v471_v1  ;;  %v1751_v6 = vunpack.c.h.bf16 %v1525_v0  ;;  %598 = vmatpush.bf16.msra.mxu0 %v1514_v33 }
  0x12   : > { %v478_v4 = vsel %vm477_vm0, %v1743_v2, 0.0  ;;  %v484_v5 = vsel %vm477_vm0, %v1745_v3, 0.0  ;;  %v481_v7 = vsel %vm477_vm0, %v1751_v6, 0.0  ;;  %v1562_v9 = vpop.eup %1561 }
  0x13   : > { %479 = vadd.xlane.f32.xlu0 %v478_v4  ;;  %485 = vadd.xlane.f32.xlu1 %v484_v5  ;;  %v488_v10 = vmul.f32 32.0, %v1562_v9  ;;  %vm492_vm1 = vweird.f32 %v1562_v9 }
  0x15   : > { %v489_v11 = vsub.f32 1.0, %v488_v10 }
  0x17   : > { %v490_v12 = vmul.f32 %v1562_v9, %v489_v11 }
  0x19   : > { %v491_v13 = vadd.f32 %v1562_v9, %v490_v12 }
  0x1b   : > { %482 = vadd.xlane.f32.xlu0 %v481_v7  ;;  %v1755_v14 = vsel %vm492_vm1, %v1562_v9, %v491_v13  ;;  %vm1104_vm1 = vcmask 261312  }
  0x86   : > { %v480_v15 = vpop.xlane.xlu0 %479  ;;  %v486_v19 = vpop.xlane.xlu1 %485 }
  0x87   : > { %v494_v16 = vmul.f32 %v1755_v14, %v480_v15  ;;  %v496_v23 = vmul.f32 %v1755_v14, %v486_v19 }
  0x89   : > { %v497_v17 = vsub.f32 %v1743_v2, %v494_v16  ;;  %v1764_v25 = vsub.f32 %v1745_v3, %v496_v23  ;;  %v1554_v16 = vld [vmem:[%s2009_s5] ss:$0 sm:$0xff] }
  0x8b   : > { %v500_v18 = vmul.f32 %v497_v17, %v497_v17  ;;  %v502_v28 = vmul.f32 %v1764_v25, %v1764_v25 }
  0x8d   : > { %v503_v20 = vsel %vm477_vm0, %v500_v18, 0.0  ;;  %v509_v29 = vsel %vm477_vm0, %v502_v28, 0.0 }
  0x8e   : > { %504 = vadd.xlane.f32.xlu1 %v503_v20  ;;  %v483_v21 = vpop.xlane.xlu0 %482 }
  0x8f   : > { %v495_v22 = vmul.f32 %v1755_v14, %v483_v21 }
  0x91   : > { %v498_v24 = vsub.f32 %v1751_v6, %v495_v22 }
  0x93   : > { %v501_v26 = vmul.f32 %v498_v24, %v498_v24 }
  0x95   : > { %v506_v27 = vsel %vm477_vm0, %v501_v26, 0.0 }
  0x96   : > { %507 = vadd.xlane.f32.xlu2 %v506_v27 }
  0x9e   : > { %510 = vadd.xlane.f32.xlu2 %v509_v29 }
 0x101   : > { %v505_v31 = vpop.xlane.xlu1 %504 }
 0x102   : > { %v512_v32 = vmul.f32 %v505_v31, %v1755_v14 }
 0x104   : > { %v515_v34 = vadd.f32 1e-06, %v512_v32 }
 0x106   : > { %1563 = vrsqrt.f32 %v515_v34  ;;  %vm524_vm3 = vweird.f32 %v515_v34 }
 0x109   : > { %v508_v35 = vpop.xlane.xlu2 %507 }
 0x10a   : > { %v513_v36 = vmul.f32 %v508_v35, %v1755_v14 }
 0x10c   : > { %v1564_v37 = vpop.eup %1563  ;;  %v516_v38 = vadd.f32 1e-06, %v513_v36 }
 0x10d   : > { %v519_v39 = vmul.f32 %v1564_v37, %v515_v34  ;;  %vm525_vm2 = vweird.f32 %v1564_v37 }
 0x10e   : > { %1565 = vrsqrt.f32 %v516_v38  ;;  %vm526_vm4 = vmor %vm524_vm3, %vm525_vm2  ;;  %vm534_vm6 = vweird.f32 %v516_v38 }
 0x10f   : > { %v520_v40 = vmul.f32 %v1564_v37, %v519_v39 }
 0x111   : > { %v521_v41 = vmul.f32 0.5, %v520_v40  ;;  %v511_v42 = vpop.xlane.xlu2 %510 }
 0x112   : > { %v514_v43 = vmul.f32 %v511_v42, %v1755_v14 }
 0x113   : > { %v522_v44 = vsub.f32 1.5, %v521_v41 }
 0x114   : > { %v1566_v45 = vpop.eup %1565  ;;  %v517_v46 = vadd.f32 1e-06, %v514_v43 }
 0x115   : > { %v523_v47 = vmul.f32 %v1564_v37, %v522_v44  ;;  %v529_v48 = vmul.f32 %v1566_v45, %v516_v38  ;;  %vm535_vm5 = vweird.f32 %v1566_v45 }
 0x116   : > { %1567 = vrsqrt.f32 %v517_v46  ;;  %vm536_vm7 = vmor %vm534_vm6, %vm535_vm5  ;;  %vm544_vm8 = vweird.f32 %v517_v46 }
 0x117   : > { %v530_v49 = vmul.f32 %v1566_v45, %v529_v48  ;;  %v527_v50 = vsel %vm526_vm4, %v1564_v37, %v523_v47 }
 0x118   : > { %v548_v54 = vmul.f32 %v527_v50, %v497_v17 }
 0x119   : > { %v531_v51 = vmul.f32 0.5, %v530_v49 }
 0x11a   : > { %v554_v61 = vmul.f32 %v1552_v55, %v548_v54 }
 0x11b   : > { %v532_v52 = vsub.f32 1.5, %v531_v51  ;;  %v1815_v51 = vld [vmem:[%s2005_s1] ss:$0 sm:$0xff] }
 0x11c   : > { %v1568_v53 = vpop.eup %1567  ;;  %v560_v4 = vadd.f32 %v1553_v62, %v554_v61 }
 0x11d   : > { %v533_v56 = vmul.f32 %v1566_v45, %v532_v52  ;;  %v539_v57 = vmul.f32 %v1568_v53, %v517_v46  ;;  %vm545_vm9 = vweird.f32 %v1568_v53 }
 0x11e   : > { %vm546_vm10 = vmor %vm544_vm8, %vm545_vm9 }
 0x11f   : > { %v537_v58 = vsel %vm536_vm7, %v1566_v45, %v533_v56  ;;  %v540_v59 = vmul.f32 %v1568_v53, %v539_v57 }
 0x120   : > { %v549_v60 = vmul.f32 %v537_v58, %v498_v24 }
 0x121   : > { %v541_v63 = vmul.f32 0.5, %v540_v59 }
 0x122   : > { %v555_v0 = vmul.f32 %v1552_v55, %v549_v60 }
 0x123   : > { %v542_v1 = vsub.f32 1.5, %v541_v63 }
 0x124   : > { %v561_v5 = vadd.f32 %v1553_v62, %v555_v0 }
 0x125   : > { %v543_v7 = vmul.f32 %v1568_v53, %v542_v1 }
 0x126   : > { %v563_v8 = vpack.c.bf16 %v561_v5, %v560_v4 }
 0x127   : > { %v547_v9 = vsel %vm546_vm10, %v1568_v53, %v543_v7 }
 0x128   : > { %1456 = vmatmul.msk.bf16.vlgmr.msra.gmra.mxu0 %vm477_vm0, %v563_v8  ;;  %v550_v10 = vmul.f32 %v547_v9, %v1764_v25 }
 0x12a   : > { %v556_v11 = vmul.f32 %v1552_v55, %v550_v10 }
 0x12c   : > { %v562_v12 = vadd.f32 %v1553_v62, %v556_v11 }
 0x12e   : > { %v564_v13 = vpack.c.bf16 %v562_v12, %v562_v12 }
 0x138   : > { %1457 = vmatmul.msk.bf16.gmra.mxu0 %vm477_vm0, %v564_v13 }
 0x1a5   : > { %v600_v15 = vpop.f32.mrf.mxu0 }
 0x1a6   : > { %v601_v17 = vadd.f32 %v1554_v16, %v600_v15 }
 0x1a8   : > { %v615_v19 = vpack.c.bf16 %v601_v17, %v601_v17  ;;  %v609_v32 = vmul.f32 0.35355338, %v601_v17 }
 0x1aa   : > { %v633_v22 = vunpack.c.l.b16 %v615_v19  ;;  %v612_v34 = vpack.c.bf16 %v609_v32, %v609_v32 }
 0x1ac   : > { %v625_v36 = vunpack.c.l.b16 %v612_v34 }
 0x1ad   : > { %v602_v18 = vpop.f32.mrf.mxu0 }
 0x1ae   : > { %v603_v20 = vadd.f32 %v1554_v16, %v602_v18 }
 0x1b0   : > { %v616_v21 = vpack.c.bf16 %v603_v20, %v603_v20  ;;  %v610_v31 = vmul.f32 0.35355338, %v603_v20 }
 0x1b2   : > { %v634_v23 = vunpack.c.l.b16 %v616_v21  ;;  %v613_v33 = vpack.c.bf16 %v610_v31, %v610_v31 }
 0x1b4   : > { %v1791_v24 = vpack.c.b16 %v634_v23, %v633_v22  ;;  %v626_v35 = vunpack.c.l.b16 %v613_v33 }
 0x1b5   : > { %v605_v25 = vpop.f32.mrf.mxu0 }
 0x1b6   : > { %v606_v26 = vadd.f32 %v1554_v16, %v605_v25  ;;  %638 = vrot.lane.b32.xlu1 %v1791_v24, %s1638_s16  ;;  %v1801_v37 = vpack.c.b16 %v626_v35, %v625_v36 }
 0x1b8   : > { %v617_v27 = vpack.c.bf16 %v606_v26, %v606_v26  ;;  %v611_v46 = vmul.f32 0.35355338, %v606_v26 }
 0x1ba   : > { %v635_v28 = vunpack.c.l.b16 %v617_v27  ;;  %v614_v47 = vpack.c.bf16 %v611_v46, %v611_v46 }
 0x1bc   : > { %v1794_v29 = vpack.c.b16 %v635_v28, %v635_v28  ;;  %v627_v49 = vunpack.c.l.b16 %v614_v47 }
 0x1bd   : > { %v607_v30 = vpop.f32.mrf.mxu0 }
 0x1be   : > { %640 = vrot.lane.b32.xlu0 %v1794_v29, %s1638_s16  ;;  %v629_v50 = vpack.c.b16 %v627_v49, %v627_v49  ;;  %s1649_s16 = smov 8  }
 0x1c6   : > { %751 = vrot.lane.b32.xlu0 %v1794_v29, %s1639_s17 }
 0x1ce   : > { %711 = vrot.lane.b32.xlu0 %v1794_v29, %s1640_s18 }
 0x1d6   : > { %709 = vrot.lane.b32.xlu0 %v1791_v24, %s1640_s18  ;;  %s1651_s18 = smov 24  }
 0x1de   : > { %745 = vrot.lane.b32.xlu0 %v1801_v37, %s1641_s19 }
 0x228   : > { %v639_v40 = vpop.permute.xlu1 %638 }
 0x229   : > { %v650_v42 = vsel %vm642_vm11, %v639_v40, 0 }
 0x230   : > { %v641_v38 = vpop.permute.xlu0 %640 }
 0x231   : > { %v653_v39 = vsel %vm642_vm11, %v641_v38, 0 }
 0x232   : > { %661 = vmatpush.bf16.xpose.msra.mxu1 %v653_v39 }
 0x238   : > { %v752_v41 = vpop.permute.xlu0 %751 }
 0x239   : > { %v763_v43 = vsel %vm642_vm11, %v752_v41, 0 }
 0x23a   : > { %662 = vmatpush.bf16.xpose.msra.mxu1 %v650_v42  ;;  %771 = vmatpush.bf16.xpose.msra.mxu3 %v763_v43 }
 0x240   : > { %v712_v44 = vpop.permute.xlu0 %711 }
 0x241   : > { %1458 = vmatmul.msk.bf16.vlgmr.msra.gmra.mxu1 %vm642_vm11, %v1801_v37  ;;  %v722_v45 = vsel %vm720_vm12, %v712_v44, 0 }
 0x242   : > { %730 = vmatpush.bf16.msra.mxu2 %v722_v45 }
 0x248   : > { %v710_v48 = vpop.permute.xlu0 %709 }
 0x249   : > { %731 = vmatpush.bf16.msra.mxu2 %v710_v48 }
 0x250   : > { %v746_v13 = vpop.permute.xlu0 %745 }
 0x251   : > { %1459 = vmatmul.msk.bf16.gmra.mxu1 %vm642_vm11, %v629_v50 }
 0x2be   : > { %v664_v52 = vpop.f32.mrf.mxu1 }
 0x2bf   : > { %v665_v53 = vadd.f32 %v1815_v51, %v664_v52 }
 0x2c1   : > { %v674_v54 = vsel %vm673_vm13, %v665_v53, -inf }
 0x2c2   : > { %675 = vmax.xlane.f32.xlu2 %v674_v54 }
 0x2c6   : > { %v666_v55 = vpop.f32.mrf.mxu1 }
 0x2c7   : > { %v667_v56 = vadd.f32 %v1815_v51, %v666_v55 }
 0x2c9   : > { %v677_v57 = vsel %vm673_vm13, %v667_v56, -inf }
 0x2ca   : > { %678 = vmax.xlane.f32.xlu2 %v677_v57 }
 0x2ce   : > { %v669_v58 = vpop.f32.mrf.mxu1 }
 0x2cf   : > { %v670_v60 = vadd.f32 %v1815_v51, %v669_v58 }
 0x2d1   : > { %v680_v61 = vsel %vm673_vm13, %v670_v60, -inf }
 0x2d6   : > { %v671_v59 = vpop.f32.mrf.mxu1 }
 0x2e2   : > { %749 = vrot.lane.b32.xlu2 %v1791_v24, %s1639_s17  ;;  %s1650_s17 = smov 16  }
 0x30b   : > { %681 = vmax.xlane.f32.xlu2 %v680_v61 }
 0x335   : > { %v676_v62 = vpop.xlane.xlu2 %675 }
 0x336   : > { %v683_v63 = vsub.f32 %v665_v53, %v676_v62 }
 0x338   : > { %v686_v0 = vmul.f32 1.442695, %v683_v63 }
 0x33a   : > { %1569 = vpow2.f32 %v686_v0 }
 0x33d   : > { %v679_v1 = vpop.xlane.xlu2 %678 }
 0x33e   : > { %v684_v4 = vsub.f32 %v667_v56, %v679_v1 }
 0x340   : > { %v1570_v5 = vpop.eup %1569  ;;  %v688_v7 = vmul.f32 1.442695, %v684_v4 }
 0x341   : > { %v692_v8 = vsel %vm673_vm13, %v1570_v5, 0.0 }
 0x342   : > { %1571 = vpow2.f32 %v688_v7  ;;  %693 = vadd.xlane.f32.xlu2 %v692_v8 }
 0x345   : > { %v750_v9 = vpop.permute.xlu2 %749 }
 0x346   : > { %v760_v10 = vsel %vm642_vm11, %v750_v9, 0 }
 0x347   : > { %772 = vmatpush.bf16.xpose.msra.mxu3 %v760_v10 }
 0x348   : > { %v1572_v11 = vpop.eup %1571 }
 0x349   : > { %v695_v12 = vsel %vm673_vm13, %v1572_v11, 0.0 }
 0x34a   : > { %696 = vadd.xlane.f32.xlu1 %v695_v12 }
 0x34e   : > { %1462 = vmatmul.msk.bf16.vlgmr.msra.gmra.mxu3 %vm642_vm11, %v746_v13 }
 0x35a   : > { %872 = vrot.lane.b32.xlu2 %v1794_v29, %s1642_s22 }
 0x362   : > { %747 = vrot.lane.b32.xlu2 %v629_v50, %s1641_s19 }
 0x363   : > { %993 = vrot.lane.b32.xlu1 %v1794_v29, %s1643_s23 }
 0x36a   : > { %870 = vrot.lane.b32.xlu2 %v1791_v24, %s1642_s22 }
 0x36b   : > { %987 = vrot.lane.b32.xlu1 %v1801_v37, %s1644_s24 }
 0x372   : > { %991 = vrot.lane.b32.xlu2 %v1791_v24, %s1643_s23 }
 0x37a   : > { %866 = vrot.lane.b32.xlu2 %v1801_v37, %s1645_s25 }
 0x37e   : > { %v682_v15 = vpop.xlane.xlu2 %681 }
 0x37f   : > { %v685_v16 = vsub.f32 %v670_v60, %v682_v15 }
 0x381   : > { %v690_v17 = vmul.f32 1.442695, %v685_v16 }
 0x382   : > { %989 = vrot.lane.b32.xlu2 %v629_v50, %s1644_s24 }
 0x383   : > { %1573 = vpow2.f32 %v690_v17 }
 0x389   : > { %v1574_v18 = vpop.eup %1573 }
 0x38a   : > { %v698_v19 = vsel %vm673_vm13, %v1574_v18, 0.0 }
 0x38b   : > { %699 = vadd.xlane.f32.xlu0 %v698_v19 }
 0x39f   : > { %868 = vrot.lane.b32.xlu0 %v629_v50, %s1645_s25 }
 0x3b5   : > { %v694_v20 = vpop.xlane.xlu2 %693 }
 0x3b6   : > { %1575 = vrcp.f32 %v694_v20 }
 0x3bc   : > { %v1576_v25 = vpop.eup %1575 }
 0x3bd   : > { %v697_v21 = vpop.xlane.xlu1 %696  ;;  %v873_v22 = vpop.permute.xlu2 %872  ;;  %v704_v28 = vmul.f32 %v1576_v25, %v1570_v5 }
 0x3be   : > { %1577 = vrcp.f32 %v697_v21  ;;  %v884_v23 = vsel %vm642_vm11, %v873_v22, 0 }
 0x3bf   : > { %892 = vmatpush.bf16.xpose.msrb.mxu2 %v884_v23 }
 0x3c4   : > { %v1578_v26 = vpop.eup %1577 }
 0x3c5   : > { %v748_v27 = vpop.permute.xlu2 %747  ;;  %v705_v30 = vmul.f32 %v1578_v26, %v1572_v11 }
 0x3c6   : > { %1463 = vmatmul.msk.bf16.gmra.mxu3 %vm642_vm11, %v748_v27 }
 0x3c7   : > { %v707_v31 = vpack.c.bf16 %v705_v30, %v704_v28 }
 0x3c9   : > { %1460 = vmatmul.msk.bf16.vlgmr.msra.gmra.mxu2 %vm673_vm13, %v707_v31 }
 0x3cd   : > { %v871_v32 = vpop.permute.xlu2 %870 }
 0x3ce   : > { %v881_v33 = vsel %vm642_vm11, %v871_v32, 0 }
 0x3cf   : > { %893 = vmatpush.bf16.xpose.msrb.mxu2 %v881_v33 }
 0x3d1   : > { %v774_v34 = vpop.f32.mrf.mxu3 }
 0x3d2   : > { %v775_v35 = vadd.f32 %v1815_v51, %v774_v34 }
 0x3d4   : > { %v783_v36 = vsel %vm673_vm13, %v775_v35, -inf }
 0x3d5   : > { %v994_v37 = vpop.permute.xlu1 %993  ;;  %784 = vmax.xlane.f32.xlu1 %v783_v36  ;;  %v992_v41 = vpop.permute.xlu2 %991 }
 0x3d6   : > { %v1005_v38 = vsel %vm642_vm11, %v994_v37, 0  ;;  %v1002_v43 = vsel %vm642_vm11, %v992_v41, 0 }
 0x3d7   : > { %1013 = vmatpush.bf16.xpose.msrb.mxu3 %v1005_v38 }
 0x3d9   : > { %v776_v39 = vpop.f32.mrf.mxu3 }
 0x3da   : > { %v777_v40 = vadd.f32 %v1815_v51, %v776_v39 }
 0x3dc   : > { %v786_v42 = vsel %vm673_vm13, %v777_v40, -inf }
 0x3dd   : > { %787 = vmax.xlane.f32.xlu2 %v786_v42  ;;  %v988_v44 = vpop.permute.xlu1 %987  ;;  %v867_v45 = vpop.permute.xlu2 %866 }
 0x3df   : > { %1014 = vmatpush.bf16.xpose.msrb.mxu3 %v1002_v43 }
 0x3e5   : > { %v990_v46 = vpop.permute.xlu2 %989 }
 0x3e6   : > { %1470 = vmatmul.msk.bf16.vlgmr.msrb.gmra.mxu3 %vm642_vm11, %v988_v44 }
 0x3f6   : > { %1471 = vmatmul.msk.bf16.gmra.mxu3 %vm642_vm11, %v990_v46 }
 0x3fe   : > { %v700_v47 = vpop.xlane.xlu0 %699 }
 0x3ff   : > { %1579 = vrcp.f32 %v700_v47 }
 0x405   : > { %v1580_v48 = vpop.eup %1579 }
 0x406   : > { %v706_v49 = vmul.f32 %v1580_v48, %v1574_v18 }
 0x408   : > { %v708_v50 = vpack.c.bf16 %v706_v49, %v706_v49 }
 0x40a   : > { %1461 = vmatmul.msk.bf16.gmra.mxu2 %vm673_vm13, %v708_v50 }
 0x411   : > { %v869_v52 = vpop.permute.xlu0 %868 }
 0x41a   : > { %1466 = vmatmul.msk.bf16.vlgmr.msrb.gmra.mxu2 %vm642_vm11, %v867_v45 }
 0x42a   : > { %1467 = vmatmul.msk.bf16.gmra.mxu2 %vm642_vm11, %v869_v52 }
 0x448   : > { %v785_v53 = vpop.xlane.xlu1 %784 }
 0x449   : > { %v792_v54 = vsub.f32 %v775_v35, %v785_v53  ;;  %v779_v55 = vpop.f32.mrf.mxu3 }
 0x44a   : > { %v780_v56 = vadd.f32 %v1815_v51, %v779_v55 }
 0x44b   : > { %v795_v57 = vmul.f32 1.442695, %v792_v54 }
 0x44c   : > { %v733_v58 = vpop.f32.mrf.mxu2  ;;  %v789_v59 = vsel %vm673_vm13, %v780_v56, -inf }
 0x44d   : > { %1581 = vpow2.f32 %v795_v57  ;;  %742 = vst.msk [vmem:[#allocation2] sm:$0xff] %vm642_vm11, %v733_v58  ;;  %790 = vmax.xlane.f32.xlu0 %v789_v59 }
 0x450   : > { %v788_v0 = vpop.xlane.xlu2 %787 }
 0x451   : > { %v781_v60 = vpop.f32.mrf.mxu3  ;;  %v793_v1 = vsub.f32 %v777_v40, %v788_v0 }
 0x453   : > { %v1855_v61 = vpop.eup %1581  ;;  %v797_v4 = vmul.f32 1.442695, %v793_v1 }
 0x454   : > { %v735_v62 = vpop.f32.mrf.mxu2  ;;  %v801_v63 = vsel %vm673_vm13, %v1855_v61, 0.0 }
 0x455   : > { %743 = vst.msk [vmem:[#allocation2 + $0x8] sm:$0xff] %vm642_vm11, %v735_v62  ;;  %802 = vadd.xlane.f32.xlu0 %v801_v63  ;;  %1583 = vpow2.f32 %v797_v4 }
 0x45b   : > { %v1864_v9 = vpop.eup %1583 }
 0x45c   : > { %v804_v13 = vsel %vm673_vm13, %v1864_v9, 0.0 }
 0x469   : > { %818 = vrot.lane.b32.xlu0 %v1791_v24, %s1646_s26  ;;  %v1016_v5 = vpop.f32.mrf.mxu3 }
 0x46a   : > { %v1017_v7 = vadd.f32 %v1815_v51, %v1016_v5 }
 0x46c   : > { %v1025_v8 = vsel %vm673_vm13, %v1017_v7, -inf }
 0x46d   : > { %1026 = vmax.xlane.f32.xlu1 %v1025_v8 }
 0x471   : > { %v1018_v10 = vpop.f32.mrf.mxu3 }
 0x472   : > { %v1019_v11 = vadd.f32 %v1815_v51, %v1018_v10 }
 0x474   : > { %v1028_v12 = vsel %vm673_vm13, %v1019_v11, -inf }
 0x475   : > { %1029 = vmax.xlane.f32.xlu2 %v1028_v12  ;;  %805 = vadd.xlane.f32.xlu1 %v804_v13 }
 0x479   : > { %v1021_v15 = vpop.f32.mrf.mxu3 }
 0x47a   : > { %v1022_v34 = vadd.f32 %v1815_v51, %v1021_v15 }
 0x47c   : > { %v1031_v35 = vsel %vm673_vm13, %v1022_v34, -inf }
 0x481   : > { %v1023_v16 = vpop.f32.mrf.mxu3 }
 0x48d   : > { %v738_v17 = vpop.f32.mrf.mxu2 }
 0x48e   : > { %744 = vst.msk [vmem:[#allocation2 + $0x10] sm:$0xff] %vm642_vm11, %v738_v17  ;;  %vm1382_vm11 = vcmask 257024  }
 0x495   : > { %v740_v18 = vpop.f32.mrf.mxu2 }
 0x49d   : > { %v895_v19 = vpop.f32.mrf.mxu2 }
 0x49e   : > { %v896_v20 = vadd.f32 %v1815_v51, %v895_v19 }
 0x4a0   : > { %v904_v21 = vsel %vm673_vm13, %v896_v20, -inf }
 0x4a1   : > { %905 = vmax.xlane.f32.xlu1 %v904_v21 }
 0x4a5   : > { %v897_v22 = vpop.f32.mrf.mxu2 }
 0x4a6   : > { %v898_v23 = vadd.f32 %v1815_v51, %v897_v22 }
 0x4a8   : > { %v907_v25 = vsel %vm673_vm13, %v898_v23, -inf }
 0x4a9   : > { %908 = vmax.xlane.f32.xlu2 %v907_v25 }
 0x4ad   : > { %v900_v26 = vpop.f32.mrf.mxu2 }
 0x4b5   : > { %v902_v27 = vpop.f32.mrf.mxu2 }
 0x4c0   : > { %v791_v28 = vpop.xlane.xlu0 %790 }
 0x4c1   : > { %v794_v30 = vsub.f32 %v780_v56, %v791_v28  ;;  %820 = vrot.lane.b32.xlu2 %v1794_v29, %s1646_s26 }
 0x4c3   : > { %v799_v31 = vmul.f32 1.442695, %v794_v30 }
 0x4c5   : > { %1585 = vpow2.f32 %v799_v31 }
 0x4c8   : > { %v803_v52 = vpop.xlane.xlu0 %802 }
 0x4cb   : > { %v1586_v32 = vpop.eup %1585 }
 0x4cc   : > { %v807_v33 = vsel %vm673_vm13, %v1586_v32, 0.0 }
 0x4cd   : > { %808 = vadd.xlane.f32.xlu1 %v807_v33 }
 0x4d5   : > { %1032 = vmax.xlane.f32.xlu1 %v1031_v35 }
 0x4db   : > { %v819_v4 = vpop.permute.xlu0 %818 }
 0x4e0   : > { %v1027_v36 = vpop.xlane.xlu1 %1026 }
 0x4e1   : > { %v1034_v37 = vsub.f32 %v1017_v7, %v1027_v36  ;;  %v901_v7 = vadd.f32 %v1815_v51, %v900_v26 }
 0x4e3   : > { %v1037_v38 = vmul.f32 1.442695, %v1034_v37  ;;  %v910_v8 = vsel %vm673_vm13, %v901_v7, -inf }
 0x4e5   : > { %1587 = vpow2.f32 %v1037_v38 }
 0x4e8   : > { %v1030_v39 = vpop.xlane.xlu2 %1029  ;;  %v806_v46 = vpop.xlane.xlu1 %805 }
 0x4e9   : > { %v1035_v40 = vsub.f32 %v1019_v11, %v1030_v39 }
 0x4eb   : > { %v1880_v41 = vpop.eup %1587  ;;  %v1039_v42 = vmul.f32 1.442695, %v1035_v40 }
 0x4ec   : > { %v1043_v43 = vsel %vm673_vm13, %v1880_v41, 0.0 }
 0x4ed   : > { %1589 = vpow2.f32 %v1039_v42  ;;  %1044 = vadd.xlane.f32.xlu1 %v1043_v43 }
 0x4f3   : > { %v1590_v44 = vpop.eup %1589 }
 0x4f4   : > { %v1046_v45 = vsel %vm673_vm13, %v1590_v44, 0.0 }
 0x4f5   : > { %1047 = vadd.xlane.f32.xlu1 %v1046_v45 }
 0x50e   : > { %941 = vrot.lane.b32.xlu1 %v1794_v29, %s1647_s27 }
 0x514   : > { %v906_v47 = vpop.xlane.xlu1 %905 }
 0x515   : > { %v913_v48 = vsub.f32 %v896_v20, %v906_v47 }
 0x517   : > { %v916_v49 = vmul.f32 1.442695, %v913_v48 }
 0x519   : > { %1591 = vpow2.f32 %v916_v49 }
 0x51a   : > { %1593 = vrcp.f32 %v806_v46 }
 0x51b   : > { %1595 = vrcp.f32 %v803_v52 }
 0x51c   : > { %v909_v50 = vpop.xlane.xlu2 %908 }
 0x51d   : > { %v914_v53 = vsub.f32 %v898_v23, %v909_v50 }
 0x51f   : > { %v1592_v54 = vpop.eup %1591  ;;  %v918_v55 = vmul.f32 1.442695, %v914_v53 }
 0x520   : > { %v922_v56 = vsel %vm673_vm13, %v1592_v54, 0.0  ;;  %v1594_v57 = vpop.eup %1593 }
 0x521   : > { %1597 = vpow2.f32 %v918_v55  ;;  %923 = vadd.xlane.f32.xlu0 %v922_v56  ;;  %v1596_v60 = vpop.eup %1595  ;;  %v814_v63 = vmul.f32 %v1594_v57, %v1864_v9 }
 0x522   : > { %v813_v1 = vmul.f32 %v1596_v60, %v1855_v61 }
 0x524   : > { %v821_v58 = vpop.permute.xlu2 %820  ;;  %v816_v5 = vpack.c.bf16 %v814_v63, %v813_v1 }
 0x525   : > { %v830_v59 = vsel %vm720_vm12, %v821_v58, 0 }
 0x526   : > { %838 = vmatpush.bf16.msrb.mxu0 %v830_v59 }
 0x527   : > { %v1598_v62 = vpop.eup %1597 }
 0x528   : > { %v925_v0 = vsel %vm673_vm13, %v1598_v62, 0.0 }
 0x529   : > { %926 = vadd.xlane.f32.xlu2 %v925_v0 }
 0x52a   : > { %839 = vmatpush.bf16.msrb.mxu0 %v819_v4 }
 0x52d   : > { %1464 = vmatmul.msk.bf16.vlgmr.msrb.gmra.mxu0 %vm673_vm13, %v816_v5  ;;  %v1517_v5 = vld [vmem:[%s2010_s6 + $0x8] sm:$0xff] }
 0x52e   : > { %1145 = vmatpush.bf16.msra.mxu2 %v1517_v5 }
 0x535   : > { %1062 = vrot.lane.b32.xlu0 %v1794_v29, %s1648_s28 }
 0x538   : > { %911 = vmax.xlane.f32.xlu1 %v910_v8 }
 0x540   : > { %v809_v10 = vpop.xlane.xlu1 %808 }
 0x541   : > { %1599 = vrcp.f32 %v809_v10  ;;  %939 = vrot.lane.b32.xlu2 %v1791_v24, %s1647_s27 }
 0x547   : > { %v1600_v61 = vpop.eup %1599 }
 0x548   : > { %v815_v9 = vmul.f32 %v1600_v61, %v1586_v32  ;;  %v1033_v11 = vpop.xlane.xlu1 %1032 }
 0x549   : > { %v1036_v13 = vsub.f32 %v1022_v34, %v1033_v11 }
 0x54a   : > { %v817_v12 = vpack.c.bf16 %v815_v9, %v815_v9 }
 0x54b   : > { %v1041_v15 = vmul.f32 1.442695, %v1036_v13 }
 0x54c   : > { %1465 = vmatmul.msk.bf16.gmra.mxu0 %vm673_vm13, %v817_v12 }
 0x54d   : > { %1601 = vpow2.f32 %v1041_v15 }
 0x551   : > { %1060 = vrot.lane.b32.xlu1 %v1791_v24, %s1648_s28 }
 0x553   : > { %v1602_v29 = vpop.eup %1601 }
 0x554   : > { %v1049_v51 = vsel %vm673_vm13, %v1602_v29, 0.0 }
 0x55f   : > { %1050 = vadd.xlane.f32.xlu0 %v1049_v51 }
 0x560   : > { %v1045_v16 = vpop.xlane.xlu1 %1044 }
 0x561   : > { %1603 = vrcp.f32 %v1045_v16 }
 0x567   : > { %v1604_v18 = vpop.eup %1603 }
 0x568   : > { %v1048_v17 = vpop.xlane.xlu1 %1047  ;;  %v1055_v20 = vmul.f32 %v1604_v18, %v1880_v41 }
 0x569   : > { %1605 = vrcp.f32 %v1048_v17  ;;  %v1556_v17 = vld [vmem:[%s2011_s7] ss:$0 sm:$0xff] }
 0x56f   : > { %v1606_v19 = vpop.eup %1605 }
 0x570   : > { %v1056_v21 = vmul.f32 %v1606_v19, %v1590_v44 }
 0x572   : > { %v1058_v22 = vpack.c.bf16 %v1056_v21, %v1055_v20 }
 0x580   : > { %v942_v23 = vpop.permute.xlu1 %941 }
 0x581   : > { %v951_v25 = vsel %vm720_vm12, %v942_v23, 0 }
 0x582   : > { %959 = vmatpush.bf16.msrb.mxu1 %v951_v25 }
 0x594   : > { %v924_v24 = vpop.xlane.xlu0 %923 }
 0x595   : > { %1607 = vrcp.f32 %v924_v24 }
 0x59b   : > { %v1608_v27 = vpop.eup %1607 }
 0x59c   : > { %v927_v26 = vpop.xlane.xlu2 %926  ;;  %v934_v30 = vmul.f32 %v1608_v27, %v1592_v54 }
 0x59d   : > { %1609 = vrcp.f32 %v927_v26 }
 0x5a3   : > { %v1610_v28 = vpop.eup %1609 }
 0x5a4   : > { %v935_v31 = vmul.f32 %v1610_v28, %v1598_v62  ;;  %v940_v32 = vpop.permute.xlu2 %939 }
 0x5a5   : > { %960 = vmatpush.bf16.msrb.mxu1 %v940_v32 }
 0x5a6   : > { %v937_v33 = vpack.c.bf16 %v935_v31, %v934_v30 }
 0x5a7   : > { %v1063_v34 = vpop.permute.xlu0 %1062 }
 0x5a8   : > { %v1072_v35 = vsel %vm720_vm12, %v1063_v34, 0  ;;  %1468 = vmatmul.msk.bf16.vlgmr.msrb.gmra.mxu1 %vm673_vm13, %v937_v33 }
 0x5a9   : > { %1080 = vmatpush.bf16.msra.mxu0 %v1072_v35 }
 0x5aa   : > { %v841_v36 = vpop.f32.mrf.mxu0 }
 0x5ab   : > { %v912_v37 = vpop.xlane.xlu1 %911  ;;  %853 = vrot.lane.b32.xlu2 %v841_v36, %s1649_s16 }
 0x5ac   : > { %v915_v38 = vsub.f32 %v901_v7, %v912_v37  ;;  %v1516_v7 = vld [vmem:[%s2010_s6] sm:$0xff] }
 0x5ad   : > { %1146 = vmatpush.bf16.msra.mxu2 %v1516_v7 }
 0x5ae   : > { %v920_v39 = vmul.f32 1.442695, %v915_v38 }
 0x5b0   : > { %1611 = vpow2.f32 %v920_v39 }
 0x5b2   : > { %v843_v40 = vpop.f32.mrf.mxu0 }
 0x5b3   : > { %855 = vrot.lane.b32.xlu2 %v843_v40, %s1649_s16 }
 0x5b6   : > { %v1612_v41 = vpop.eup %1611 }
 0x5b7   : > { %v928_v42 = vsel %vm673_vm13, %v1612_v41, 0.0 }
 0x5b8   : > { %929 = vadd.xlane.f32.xlu1 %v928_v42 }
 0x5c3   : > { %v1061_v43 = vpop.permute.xlu1 %1060 }
 0x5c4   : > { %1081 = vmatpush.bf16.msra.mxu0 %v1061_v43 }
 0x5c7   : > { %1472 = vmatmul.msk.bf16.vlgmr.msra.gmra.mxu0 %vm673_vm13, %v1058_v22 }
 0x5c9   : > { %v846_v44 = vpop.f32.mrf.mxu0 }
 0x5ca   : > { %857 = vrot.lane.b32.xlu0 %v846_v44, %s1649_s16  ;;  %v1519_v44 = vld [vmem:[%s2014_s10 + $0x8] sm:$0xff] }
 0x5cb   : > { %1274 = vmatpush.bf16.msra.mxu1 %v1519_v44 }
 0x5d1   : > { %v848_v45 = vpop.f32.mrf.mxu0 }
 0x5d2   : > { %v1051_v46 = vpop.xlane.xlu0 %1050 }
 0x5d3   : > { %1613 = vrcp.f32 %v1051_v46 }
 0x5d9   : > { %v1614_v47 = vpop.eup %1613 }
 0x5da   : > { %v1057_v48 = vmul.f32 %v1614_v47, %v1602_v29  ;;  %v1518_v47 = vld [vmem:[%s2014_s10] sm:$0xff] }
 0x5db   : > { %1275 = vmatpush.bf16.msra.mxu1 %v1518_v47 }
 0x5dc   : > { %v1059_v49 = vpack.c.bf16 %v1057_v48, %v1057_v48 }
 0x5de   : > { %1473 = vmatmul.msk.bf16.gmra.mxu0 %vm673_vm13, %v1059_v49 }
 0x605   : > { %v854_v50 = vpop.permute.xlu2 %853 }
 0x606   : > { %863 = vst.msk [vmem:[#allocation2] sm:$0xff] %vm862_vm14, %v854_v50 }
 0x60d   : > { %v856_v52 = vpop.permute.xlu2 %855 }
 0x60e   : > { %864 = vst.msk [vmem:[#allocation2 + $0x8] sm:$0xff] %vm862_vm14, %v856_v52 }
 0x625   : > { %v962_v53 = vpop.f32.mrf.mxu1 }
 0x626   : > { %974 = vrot.lane.b32.xlu2 %v962_v53, %s1650_s17 }
 0x62b   : > { %v930_v54 = vpop.xlane.xlu1 %929 }
 0x62c   : > { %1615 = vrcp.f32 %v930_v54 }
 0x62d   : > { %v964_v55 = vpop.f32.mrf.mxu1 }
 0x62e   : > { %976 = vrot.lane.b32.xlu2 %v964_v55, %s1650_s17 }
 0x632   : > { %v1616_v56 = vpop.eup %1615 }
 0x633   : > { %v936_v57 = vmul.f32 %v1616_v56, %v1612_v41 }
 0x635   : > { %v938_v58 = vpack.c.bf16 %v936_v57, %v936_v57 }
 0x637   : > { %1469 = vmatmul.msk.bf16.gmra.mxu1 %vm673_vm13, %v938_v58 }
 0x63c   : > { %v858_v59 = vpop.permute.xlu0 %857 }
 0x63d   : > { %865 = vst.msk [vmem:[#allocation2 + $0x10] sm:$0xff] %vm862_vm14, %v858_v59 }
 0x644   : > { %v1083_v60 = vpop.f32.mrf.mxu0 }
 0x645   : > { %1095 = vrot.lane.b32.xlu1 %v1083_v60, %s1651_s18 }
 0x64c   : > { %v1085_v62 = vpop.f32.mrf.mxu0 }
 0x64d   : > { %1097 = vrot.lane.b32.xlu2 %v1085_v62, %s1651_s18 }
 0x65b   : > { %v1088_v63 = vpop.f32.mrf.mxu0 }
 0x663   : > { %v1090_v0 = vpop.f32.mrf.mxu0 }
 0x680   : > { %v975_v1 = vpop.permute.xlu2 %974 }
 0x681   : > { %984 = vst.msk [vmem:[#allocation2] sm:$0xff] %vm983_vm15, %v975_v1 }
 0x688   : > { %v977_v4 = vpop.permute.xlu2 %976 }
 0x689   : > { %985 = vst.msk [vmem:[#allocation2 + $0x8] sm:$0xff] %vm983_vm15, %v977_v4  ;;  %v1557_v4 = vld [vmem:[%s2012_s8] ss:$0 sm:$0xff] }
 0x6a7   : > { %v1098_v8 = vpop.permute.xlu2 %1097 }
 0x6a8   : > { %1106 = vst.msk [vmem:[#allocation2 + $0x8] sm:$0xff] %vm1104_vm1, %v1098_v8 }
 0x6af   : > { %v1109_v12 = vld [vmem:[#allocation2 + $0x8] sm:$0xff] }
 0x6b4   : > { %v967_v10 = vpop.f32.mrf.mxu1 }
 0x6b5   : > { %978 = vrot.lane.b32.xlu2 %v967_v10, %s1650_s17  ;;  %v1558_v10 = vld [vmem:[%s2013_s9] ss:$0 sm:$0xff] }
 0x6b7   : > { %v1096_v61 = vpop.permute.xlu1 %1095 }
 0x6b8   : > { %1105 = vst.msk [vmem:[#allocation2] sm:$0xff] %vm1104_vm1, %v1096_v61 }
 0x6bc   : > { %v969_v9 = vpop.f32.mrf.mxu1 }
 0x6bd   : > { %1099 = vrot.lane.b32.xlu2 %v1088_v63, %s1651_s18 }
 0x6bf   : > { %v1108_v11 = vld [vmem:[#allocation2] sm:$0xff] }
 0x6c0   : > { %v1111_v13 = vpack.c.bf16 %v1109_v12, %v1108_v11 }
 0x6c2   : > { %1482 = vmatmul.msk.bf16.vlgmr.msra.gmra.mxu2 %vm477_vm0, %v1111_v13 }
 0x70f   : > { %v979_v15 = vpop.permute.xlu2 %978 }
 0x710   : > { %986 = vst.msk [vmem:[#allocation2 + $0x10] sm:$0xff] %vm983_vm15, %v979_v15 }
 0x717   : > { %v1100_v29 = vpop.permute.xlu2 %1099 }
 0x718   : > { %1107 = vst.msk [vmem:[#allocation2 + $0x10] sm:$0xff] %vm1104_vm1, %v1100_v29 }
 0x71f   : > { %v1110_v51 = vld [vmem:[#allocation2 + $0x10] sm:$0xff] }
 0x720   : > { %v1112_v16 = vpack.c.bf16 %v1110_v51, %v1110_v51 }
 0x722   : > { %1483 = vmatmul.msk.bf16.gmra.mxu2 %vm477_vm0, %v1112_v16 }
 0x745   : > { %v1148_v18 = vpop.f32.mrf.mxu2 }
 0x746   : > { %v1149_v19 = vadd.f32 %v1556_v17, %v1148_v18 }
 0x748   : > { %v1933_v20 = vadd.f32 %v1743_v2, %v1149_v19 }
 0x74a   : > { %v1162_v21 = vsel %vm477_vm0, %v1933_v20, 0.0 }
 0x74b   : > { %1163 = vadd.xlane.f32.xlu1 %v1162_v21 }
 0x74d   : > { %v1150_v22 = vpop.f32.mrf.mxu2 }
 0x74e   : > { %v1151_v23 = vadd.f32 %v1556_v17, %v1150_v22 }
 0x750   : > { %v1938_v25 = vadd.f32 %v1751_v6, %v1151_v23 }
 0x752   : > { %v1165_v24 = vsel %vm477_vm0, %v1938_v25, 0.0 }
 0x753   : > { %1166 = vadd.xlane.f32.xlu2 %v1165_v24 }
 0x7a5   : > { %v1153_v26 = vpop.f32.mrf.mxu2 }
 0x7a6   : > { %v1154_v27 = vadd.f32 %v1556_v17, %v1153_v26 }
 0x7a8   : > { %v1943_v28 = vadd.f32 %v1154_v27, %v1745_v3 }
 0x7aa   : > { %v1168_v2 = vsel %vm477_vm0, %v1943_v28, 0.0 }
 0x7ab   : > { %1169 = vadd.xlane.f32.xlu0 %v1168_v2 }
 0x7ad   : > { %v1155_v30 = vpop.f32.mrf.mxu2 }
 0x7be   : > { %v1164_v31 = vpop.xlane.xlu1 %1163 }
 0x7bf   : > { %v1171_v32 = vmul.f32 %v1164_v31, %v1755_v14  ;;  %v1522_v31 = vld [vmem:[%s2016_s12 + $0x10] sm:$0xff] }
 0x7c1   : > { %v1174_v6 = vsub.f32 %v1933_v20, %v1171_v32  ;;  %v1521_v32 = vld [vmem:[%s2016_s12 + $0x8] sm:$0xff] }
 0x7c3   : > { %v1177_v33 = vmul.f32 %v1174_v6, %v1174_v6 }
 0x7c5   : > { %v1180_v34 = vsel %vm477_vm0, %v1177_v33, 0.0  ;;  %v1559_v33 = vld [vmem:[%s2015_s11] ss:$0 sm:$0xff] }
 0x7c6   : > { %1181 = vadd.xlane.f32.xlu2 %v1180_v34  ;;  %v1167_v35 = vpop.xlane.xlu2 %1166 }
 0x7c7   : > { %v1172_v36 = vmul.f32 %v1167_v35, %v1755_v14 }
 0x7c9   : > { %v1175_v3 = vsub.f32 %v1938_v25, %v1172_v36 }
 0x7cb   : > { %v1178_v37 = vmul.f32 %v1175_v3, %v1175_v3 }
 0x7cd   : > { %v1183_v38 = vsel %vm477_vm0, %v1178_v37, 0.0 }
 0x7ce   : > { %1184 = vadd.xlane.f32.xlu1 %v1183_v38 }
 0x81e   : > { %v1170_v39 = vpop.xlane.xlu0 %1169 }
 0x81f   : > { %v1173_v40 = vmul.f32 %v1170_v39, %v1755_v14 }
 0x821   : > { %v1176_v41 = vsub.f32 %v1943_v28, %v1173_v40 }
 0x823   : > { %v1179_v42 = vmul.f32 %v1176_v41, %v1176_v41 }
 0x825   : > { %v1186_v43 = vsel %vm477_vm0, %v1179_v42, 0.0 }
 0x826   : > { %1187 = vadd.xlane.f32.xlu0 %v1186_v43 }
 0x839   : > { %v1182_v45 = vpop.xlane.xlu2 %1181 }
 0x83a   : > { %v1189_v46 = vmul.f32 %v1182_v45, %v1755_v14 }
 0x83c   : > { %v1192_v48 = vadd.f32 1e-06, %v1189_v46 }
 0x83e   : > { %1617 = vrsqrt.f32 %v1192_v48  ;;  %vm1201_vm3 = vweird.f32 %v1192_v48 }
 0x841   : > { %v1185_v49 = vpop.xlane.xlu1 %1184 }
 0x842   : > { %v1190_v50 = vmul.f32 %v1185_v49, %v1755_v14 }
 0x844   : > { %v1618_v52 = vpop.eup %1617  ;;  %v1193_v53 = vadd.f32 1e-06, %v1190_v50 }
 0x845   : > { %v1196_v54 = vmul.f32 %v1618_v52, %v1192_v48  ;;  %vm1202_vm2 = vweird.f32 %v1618_v52 }
 0x846   : > { %1619 = vrsqrt.f32 %v1193_v53  ;;  %vm1203_vm4 = vmor %vm1201_vm3, %vm1202_vm2  ;;  %vm1211_vm6 = vweird.f32 %v1193_v53 }
 0x847   : > { %v1197_v55 = vmul.f32 %v1618_v52, %v1196_v54 }
 0x849   : > { %v1198_v56 = vmul.f32 0.5, %v1197_v55 }
 0x84b   : > { %v1199_v57 = vsub.f32 1.5, %v1198_v56 }
 0x84c   : > { %v1620_v58 = vpop.eup %1619 }
 0x84d   : > { %v1200_v59 = vmul.f32 %v1618_v52, %v1199_v57  ;;  %v1206_v60 = vmul.f32 %v1620_v58, %v1193_v53  ;;  %vm1212_vm5 = vweird.f32 %v1620_v58 }
 0x84e   : > { %vm1213_vm7 = vmor %vm1211_vm6, %vm1212_vm5 }
 0x84f   : > { %v1207_v62 = vmul.f32 %v1620_v58, %v1206_v60  ;;  %v1204_v63 = vsel %vm1203_vm4, %v1618_v52, %v1200_v59 }
 0x850   : > { %v1225_v5 = vmul.f32 %v1204_v63, %v1174_v6  ;;  %v1520_v6 = vld [vmem:[%s2016_s12] sm:$0xff] }
 0x851   : > { %v1208_v0 = vmul.f32 0.5, %v1207_v62 }
 0x852   : > { %v1231_v61 = vmul.f32 %v1557_v4, %v1225_v5 }
 0x853   : > { %v1209_v1 = vsub.f32 1.5, %v1208_v0 }
 0x854   : > { %v1237_v12 = vadd.f32 %v1558_v10, %v1231_v61  ;;  %v1560_v61 = vld [vmem:[%s2017_s13] ss:$0 sm:$0xff] }
 0x855   : > { %v1210_v7 = vmul.f32 %v1620_v58, %v1209_v1 }
 0x857   : > { %v1214_v8 = vsel %vm1213_vm7, %v1620_v58, %v1210_v7 }
 0x858   : > { %v1226_v9 = vmul.f32 %v1214_v8, %v1175_v3 }
 0x85a   : > { %v1232_v11 = vmul.f32 %v1557_v4, %v1226_v9 }
 0x85c   : > { %v1238_v13 = vadd.f32 %v1558_v10, %v1232_v11 }
 0x85e   : > { %v1240_v15 = vpack.c.bf16 %v1238_v13, %v1237_v12 }
 0x860   : > { %1492 = vmatmul.msk.bf16.vlgmr.msra.gmra.mxu1 %vm477_vm0, %v1240_v15 }
 0x899   : > { %v1188_v29 = vpop.xlane.xlu0 %1187 }
 0x89a   : > { %v1191_v51 = vmul.f32 %v1188_v29, %v1755_v14  ;;  %v1523_v14 = vld [vmem:[%s2016_s12 + $0x18] sm:$0xff] }
 0x89b   : > { %1362 = vmatpush.bf16.msra.mxu3 %v1523_v14 }
 0x89c   : > { %v1194_v16 = vadd.f32 1e-06, %v1191_v51 }
 0x89e   : > { %1621 = vrsqrt.f32 %v1194_v16  ;;  %vm1221_vm9 = vweird.f32 %v1194_v16 }
 0x89f   : > { %1363 = vmatpush.bf16.msra.mxu3 %v1522_v31 }
 0x8a3   : > { %1364 = vmatpush.bf16.msra.mxu3 %v1521_v32 }
 0x8a4   : > { %v1622_v17 = vpop.eup %1621 }
 0x8a5   : > { %v1216_v18 = vmul.f32 %v1622_v17, %v1194_v16  ;;  %vm1222_vm8 = vweird.f32 %v1622_v17 }
 0x8a6   : > { %vm1223_vm10 = vmor %vm1221_vm9, %vm1222_vm8 }
 0x8a7   : > { %v1217_v19 = vmul.f32 %v1622_v17, %v1216_v18  ;;  %1365 = vmatpush.bf16.msra.mxu3 %v1520_v6 }
 0x8a9   : > { %v1218_v21 = vmul.f32 0.5, %v1217_v19 }
 0x8ab   : > { %v1219_v22 = vsub.f32 1.5, %v1218_v21 }
 0x8ad   : > { %v1220_v23 = vmul.f32 %v1622_v17, %v1219_v22 }
 0x8af   : > { %v1224_v24 = vsel %vm1223_vm10, %v1622_v17, %v1220_v23 }
 0x8b0   : > { %v1227_v26 = vmul.f32 %v1224_v24, %v1176_v41 }
 0x8b2   : > { %v1233_v27 = vmul.f32 %v1557_v4, %v1227_v26 }
 0x8b4   : > { %v1239_v2 = vadd.f32 %v1558_v10, %v1233_v27 }
 0x8b6   : > { %v1241_v30 = vpack.c.bf16 %v1239_v2, %v1239_v2 }
 0x8b8   : > { %1493 = vmatmul.msk.bf16.gmra.mxu1 %vm477_vm0, %v1241_v30  ;;  %vm1351_vm0 = vcmask 523264  }
 0x8dd   : > { %v1277_v34 = vpop.f32.mrf.mxu1 }
 0x8de   : > { %v1278_v35 = vadd.f32 %v1559_v33, %v1277_v34 }
 0x8e0   : > { %v1289_v36 = vmul.f32 0.044715, %v1278_v35  ;;  %v1286_v50 = vmul.f32 0.5, %v1278_v35 }
 0x8e2   : > { %v1292_v3 = vmul.f32 %v1289_v36, %v1278_v35 }
 0x8e4   : > { %v1295_v37 = vmul.f32 %v1292_v3, %v1278_v35 }
 0x8e5   : > { %v1279_v38 = vpop.f32.mrf.mxu1 }
 0x8e6   : > { %v1298_v39 = vadd.f32 %v1295_v37, %v1278_v35  ;;  %v1280_v40 = vadd.f32 %v1559_v33, %v1279_v38 }
 0x8e8   : > { %v1290_v41 = vmul.f32 0.044715, %v1280_v40  ;;  %v1301_v42 = vmul.f32 0.7978846, %v1298_v39  ;;  %v1287_v52 = vmul.f32 0.5, %v1280_v40 }
 0x8ea   : > { %v1293_v43 = vmul.f32 %v1290_v41, %v1280_v40  ;;  %1623 = vtanh.f32 %v1301_v42 }
 0x8ec   : > { %v1296_v44 = vmul.f32 %v1293_v43, %v1280_v40 }
 0x8ee   : > { %v1299_v45 = vadd.f32 %v1296_v44, %v1280_v40 }
 0x8f0   : > { %v1302_v46 = vmul.f32 0.7978846, %v1299_v45  ;;  %v1624_v47 = vpop.eup %1623 }
 0x8f1   : > { %v1307_v48 = vadd.f32 1.0, %v1624_v47 }
 0x8f2   : > { %1625 = vtanh.f32 %v1302_v46 }
 0x8f3   : > { %v1310_v54 = vmul.f32 %v1307_v48, %v1286_v50 }
 0x8f8   : > { %v1626_v49 = vpop.eup %1625 }
 0x8f9   : > { %v1308_v53 = vadd.f32 1.0, %v1626_v49 }
 0x8fb   : > { %v1311_v55 = vmul.f32 %v1308_v53, %v1287_v52 }
 0x8fd   : > { %v1313_v56 = vpack.c.bf16 %v1311_v55, %v1310_v54 }
 0x8ff   : > { %1510 = vmatmul.msk.bf16.vlgmr.msra.gmra.mxu3 %vm1351_vm0, %v1313_v56 }
 0x935   : > { %v1282_v57 = vpop.f32.mrf.mxu1 }
 0x936   : > { %v1283_v58 = vadd.f32 %v1559_v33, %v1282_v57 }
 0x938   : > { %v1291_v59 = vmul.f32 0.044715, %v1283_v58  ;;  %v1288_v5 = vmul.f32 0.5, %v1283_v58 }
 0x93a   : > { %v1294_v60 = vmul.f32 %v1291_v59, %v1283_v58 }
 0x93c   : > { %v1297_v62 = vmul.f32 %v1294_v60, %v1283_v58 }
 0x93d   : > { %v1284_v63 = vpop.f32.mrf.mxu1 }
 0x93e   : > { %v1300_v0 = vadd.f32 %v1297_v62, %v1283_v58 }
 0x940   : > { %v1303_v1 = vmul.f32 0.7978846, %v1300_v0 }
 0x942   : > { %1627 = vtanh.f32 %v1303_v1 }
 0x948   : > { %v1628_v4 = vpop.eup %1627 }
 0x949   : > { %v1309_v7 = vadd.f32 1.0, %v1628_v4 }
 0x94b   : > { %v1312_v8 = vmul.f32 %v1309_v7, %v1288_v5 }
 0x94d   : > { %v1314_v10 = vpack.c.bf16 %v1312_v8, %v1312_v8 }
 0x94f   : > { %1511 = vmatmul.msk.bf16.gmra.mxu3 %vm1351_vm0, %v1314_v10 }
 0x982   : > { %v1367_v9 = vpop.f32.mrf.mxu3 }
 0x983   : > { %v1368_v11 = vadd.f32 %v1560_v61, %v1367_v9 }
 0x985   : > { %v1376_v12 = vadd.f32 %v1368_v11, %v1933_v20 }
 0x987   : > { %v1379_v13 = vpack.c.bf16 %v1376_v12, %v1376_v12 }
 0x989   : > { %1383 = vst.msk [vmem:[%s467_s21] sm:$0xf] %vm1382_vm11, %v1379_v13 }
 0x98a   : > { %v1369_v15 = vpop.f32.mrf.mxu3 }
 0x98b   : > { %v1370_v29 = vadd.f32 %v1560_v61, %v1369_v15 }
 0x98d   : > { %v1377_v51 = vadd.f32 %v1370_v29, %v1938_v25 }
 0x98f   : > { %v1380_v16 = vpack.c.bf16 %v1377_v51, %v1377_v51 }
 0x991   : > { %1384 = vst.msk [vmem:[%s467_s21 + $0x4] sm:$0xf] %vm1382_vm11, %v1380_v16 }
 0x9d2   : > { %v1372_v17 = vpop.f32.mrf.mxu3 }
 0x9d3   : > { %v1373_v18 = vadd.f32 %v1560_v61, %v1372_v17 }
 0x9d5   : > { %v1378_v19 = vadd.f32 %v1373_v18, %v1943_v28 }
 0x9d7   : > { %v1381_v21 = vpack.c.bf16 %v1378_v19, %v1378_v19 }
 0x9d9   : > { %1385 = vst.msk [vmem:[%s467_s21 + $0x8] sm:$0xf] %vm1382_vm11, %v1381_v21 }
 0x9da   : > { %v1374_v20 = vpop.f32.mrf.mxu3 }
 0x9db PF: > { %s24_s29 = sadd.s32 1, %s1635_s29  }
 0x9dc   : > { %p21_p4 = scmp.ge.s32.totalorder %s24_s29, 4  }
 0x9de   :  { %23 = sbr.rel (!%p21_p4) target bundleno = 1 (0x1), region = 106 }

</bundles_post_ra>
